<compile_context>
chip_gen: v7x
topology: tpu7x:2x2x1
jax: 0.10.0
libtpu: 0.0.40
codegen_flags: <defaults>
</compile_context>

<pallas_src>
import math

import jax
import jax.numpy as jnp
from jax.experimental import pallas as pl
from jax.experimental.pallas import tpu as pltpu

_LANE = 128


def _round_up(v, m):
    return (v + m - 1) // m * m


def _dropout_mask(seed, shape, rate, dtype=jnp.bfloat16):
    """Inverted-dropout mask matching F.dropout: 0 w.p. rate, else 1/(1-rate)."""
    keep = 1.0 - rate
    key = jax.random.PRNGKey(seed)
    bern = jax.random.bernoulli(key, p=keep, shape=shape)
    return (bern.astype(jnp.float32) / keep).astype(dtype)


def _gnn_fused_kernel(s1_ref, adj_ref, drop_ref, b1_ref, w2_ref, b2_ref,  # inputs
                      o_ref,                                              # output
                      s2_ref, acc1_ref):                                  # VMEM scratch
    p = pl.program_id(0)          # 0: layer 1 (build s2), 1: layer 2 (build out)
    i = pl.program_id(1)          # output row tile
    k = pl.program_id(2)          # contraction tile over the N nodes (reduction last)
    nk = pl.num_programs(2)

    tm = adj_ref.shape[0]
    tk = adj_ref.shape[1]

    # ---- Phase 0: h[i] = drop(relu(sum_k adj[i,k] @ s1[k] + b1));
    #      s2[i-tile] = h_bf16 @ W2 folded into the finalize (no h scratch). ----
    @pl.when(p == 0)
    def _():
        @pl.when(k == 0)
        def _():
            acc1_ref[...] = jnp.zeros_like(acc1_ref)

        acc1_ref[...] += jnp.dot(adj_ref[...], s1_ref[...],
                                 preferred_element_type=jnp.float32)

        @pl.when(k == nk - 1)
        def _():
            h = jnp.maximum(acc1_ref[...] + b1_ref[...], 0.0)
            h = h * drop_ref[...].astype(jnp.float32)      # ones in eval mode
            row0 = pl.multiple_of(i * tm, tm)
            s2_ref[pl.ds(row0, tm), :] = jnp.dot(
                h.astype(jnp.bfloat16), w2_ref[...],
                preferred_element_type=jnp.float32).astype(s2_ref.dtype)

    # ---- Phase 1: out[i] = relu(sum_k adj[i,k] @ s2[k] + b2), accumulated
    #      directly into the resident f32 output block. ----
    @pl.when(p == 1)
    def _():
        @pl.when(k == 0)
        def _():
            o_ref[...] = jnp.zeros_like(o_ref)

        col0 = pl.multiple_of(k * tk, tk)
        o_ref[...] += jnp.dot(adj_ref[...], s2_ref[pl.ds(col0, tk), :],
                              preferred_element_type=jnp.float32)

        @pl.when(k == nk - 1)
        def _():
            o_ref[...] = jnp.maximum(o_ref[...] + b2_ref[...], 0.0)


def gnn_forward(x, adj, params, dropout_rate=0.5, training=False, seed=0,
                tm=256, tk=256):
    """Fused two-layer GCN: relu(adj @ (drop(relu(adj @ (x@W1)+b1)) @ W2) + b2)."""
    w1, b1, w2, b2 = params
    n, _ = x.shape
    nhid = w1.shape[1]
    nout = w2.shape[1]
    b1 = b1.reshape(1, -1)
    b2 = b2.reshape(1, -1)

    n_pad = _round_up(n, math.lcm(tm, tk))
    f_hid = _round_up(nhid, _LANE)
    f_out = _round_up(nout, _LANE)

    # Hoisted feature transform (perf feedback): s1 = x @ W1 in plain XLA,
    # bf16 operands / f32 accumulation, then cast to bf16 for the MXU.
    s1 = jnp.dot(x.astype(jnp.bfloat16), w1.astype(jnp.bfloat16),
                 preferred_element_type=jnp.float32).astype(jnp.bfloat16)

    def pad2(a, rows, cols, dtype):
        a = a.astype(dtype)
        return jnp.pad(a, ((0, rows - a.shape[0]), (0, cols - a.shape[1])))

    s1_p = pad2(s1, n_pad, f_hid, jnp.bfloat16)
    adj_p = pad2(adj, n_pad, n_pad, jnp.bfloat16)   # bf16 halves dominant HBM bytes
    w2_p = pad2(w2, f_hid, f_out, jnp.bfloat16)
    b1_p = pad2(b1, 1, f_hid, jnp.float32)
    b2_p = pad2(b2, 1, f_out, jnp.float32)

    if training and dropout_rate > 0.0:
        mask = _dropout_mask(seed, (n, nhid), dropout_rate)
    else:
        mask = jnp.ones((n, nhid), jnp.bfloat16)
    mask_p = pad2(mask, n_pad, f_hid, jnp.bfloat16)  # padded rows/lanes -> 0

    ni = n_pad // tm
    nk = n_pad // tk
    grid = (2, ni, nk)   # (phase, row tiles, contraction tiles) — reduction axis last

    # VMEM budget from actual buffers (double-buffered inputs/outputs + scratch);
    # capped so it stays safe under v7x's 64 MiB physical VMEM.  On v5e/v6e
    # (128 MiB) this could be raised further to allow tm/tk = 512.
    vmem_bytes = (
        2 * tm * tk * 2 +                                   # adj tiles
        2 * tk * f_hid * 2 +                                # s1 tiles
        2 * tm * f_hid * 2 +                                # dropout-mask tiles
        2 * (f_hid * f_out * 2 + f_hid * 4 + f_out * 4) +   # W2, b1, b2 residents
        2 * tm * f_out * 4 +                                # output blocks
        n_pad * f_out * 2 +                                 # s2 scratch (bf16)
        tm * f_hid * 4                                      # layer-1 accumulator
    )
    vmem_limit = int(min(max(4 * vmem_bytes, 16 * 1024 * 1024), 56 * 1024 * 1024))

    grid_spec = pltpu.PrefetchScalarGridSpec(
        num_scalar_prefetch=0,
        grid=grid,
        in_specs=[
            # s1 tile: follows k in phase 0, pinned to block 0 in phase 1 (unused).
            pl.BlockSpec((tk, f_hid), lambda p, i, k: (k * (1 - p), 0)),
            # adj tile streamed in both phases.
            pl.BlockSpec((tm, tk), lambda p, i, k: (i, k)),
            # dropout mask: follows the row tile in phase 0, pinned in phase 1.
            pl.BlockSpec((tm, f_hid), lambda p, i, k: (i * (1 - p), 0)),
            pl.BlockSpec((1, f_hid), lambda p, i, k: (0, 0)),       # b1 (resident)
            pl.BlockSpec((f_hid, f_out), lambda p, i, k: (0, 0)),   # W2 (resident)
            pl.BlockSpec((1, f_out), lambda p, i, k: (0, 0)),       # b2 (resident)
        ],
        # Pin the output block to (0,0) during phase 0 so phase 0 never triggers
        # an HBM writeback; phase 1 fully overwrites every block it visits.
        out_specs=pl.BlockSpec((tm, f_out), lambda p, i, k: (i * p, 0)),
        scratch_shapes=[
            pltpu.VMEM((n_pad, f_out), jnp.bfloat16),   # s2 = dropout(h) @ W2
            pltpu.VMEM((tm, f_hid), jnp.float32),       # layer-1 accumulator
        ],
    )

    out_p = pl.pallas_call(
        _gnn_fused_kernel,
        out_shape=jax.ShapeDtypeStruct((n_pad, f_out), jnp.float32),
        grid_spec=grid_spec,
        compiler_params=pltpu.CompilerParams(
            # Phase 1 consumes the full s2 scratch written by phase 0, so no
            # grid axis can be megacore-sharded in the fused single-call form.
            dimension_semantics=("arbitrary", "arbitrary", "arbitrary"),
            vmem_limit_bytes=vmem_limit,
        ),
    )(s1_p, adj_p, mask_p, b1_p, w2_p, b2_p)

    return out_p[:n, :nout]


def init_params(key, nfeat, nhid, nout):
    k1, k2 = jax.random.split(key, 2)
    w1 = jax.random.normal(k1, (nfeat, nhid), jnp.float32) * (1.0 / jnp.sqrt(nfeat))
    b1 = jnp.full((1, nhid), 0.1, jnp.float32)
    w2 = jax.random.normal(k2, (nhid, nout), jnp.float32) * (1.0 / jnp.sqrt(nhid))
    b2 = jnp.full((1, nout), 0.05, jnp.float32)
    return (w1, b1, w2, b2)


def _reference(x, adj, params, mask=None):
    """Plain-JAX reference mirroring the kernel's bf16-operand / f32-accum math."""
    w1, b1, w2, b2 = params
    ab = adj.astype(jnp.bfloat16)
    s1 = jnp.dot(x.astype(jnp.bfloat16), w1.astype(jnp.bfloat16),
                 preferred_element_type=jnp.float32).astype(jnp.bfloat16)
    h = jnp.maximum(jnp.dot(ab, s1, preferred_element_type=jnp.float32)
                    + b1.reshape(1, -1), 0.0)
    if mask is not None:
        h = h * mask.astype(jnp.float32)
    s2 = jnp.dot(h.astype(jnp.bfloat16), w2.astype(jnp.bfloat16),
                 preferred_element_type=jnp.float32).astype(jnp.bfloat16)
    return jnp.maximum(jnp.dot(ab, s2, preferred_element_type=jnp.float32)
                       + b2.reshape(1, -1), 0.0)


if __name__ == "__main__":
    key = jax.random.PRNGKey(0)
    kx, kadj, kp = jax.random.split(key, 3)

    N, nfeat, nhid, nout = 512, 96, 64, 16
    x = jax.random.normal(kx, (N, nfeat), jnp.float32)

    # Symmetric, row-normalized dense adjacency with self loops (typical GCN input).
    a = (jax.random.uniform(kadj, (N, N)) < 0.05).astype(jnp.float32)
    a = jnp.maximum(a, a.T) + jnp.eye(N, dtype=jnp.float32)
    adj = a / jnp.sum(a, axis=1, keepdims=True)

    params = init_params(kp, nfeat, nhid, nout)

    # Eval-mode forward (dropout is identity).
    out = gnn_forward(x, adj, params, dropout_rate=0.5, training=False)
    out = jax.block_until_ready(out)
    assert out.shape == (N, nout)
    ref = _reference(x, adj, params)
    assert bool(jnp.all(jnp.isfinite(out)))
    assert float(jnp.max(out)) > 0.0
    assert jnp.allclose(out, ref, atol=5e-3, rtol=5e-3), \
        float(jnp.max(jnp.abs(out - ref)))

    # Training-mode forward: mask is generated in the wrapper from `seed`, so we
    # can reproduce it exactly for the reference.
    out_tr = gnn_forward(x, adj, params, dropout_rate=0.5, training=True, seed=123)
    out_tr = jax.block_until_ready(out_tr)
    assert out_tr.shape == (N, nout)
    mask_tr = _dropout_mask(123, (N, nhid), 0.5)
    ref_tr = _reference(x, adj, params, mask=mask_tr)
    assert bool(jnp.all(jnp.isfinite(out_tr)))
    assert jnp.allclose(out_tr, ref_tr, atol=5e-3, rtol=5e-3), \
        float(jnp.max(jnp.abs(out_tr - ref_tr)))

    print("KERNEL_OK")
</pallas_src>

<mosaic_0001>
module attributes {stable_mosaic.version = 11 : i64} {
  func.func @_gnn_fused_kernel(%arg0: i32, %arg1: i32, %arg2: i32, %arg3: memref<256x128xbf16, #tpu.memory_space<vmem>>, %arg4: memref<256x256xbf16, #tpu.memory_space<vmem>>, %arg5: memref<256x128xbf16, #tpu.memory_space<vmem>>, %arg6: memref<1x128xf32, #tpu.memory_space<vmem>>, %arg7: memref<128x128xbf16, #tpu.memory_space<vmem>>, %arg8: memref<1x128xf32, #tpu.memory_space<vmem>>, %arg9: memref<256x128xf32, #tpu.memory_space<vmem>>, %arg10: memref<512x128xbf16, #tpu.memory_space<vmem>>, %arg11: memref<256x128xf32, #tpu.memory_space<vmem>>) attributes {dimension_semantics = [#tpu.dimension_semantics<arbitrary>, #tpu.dimension_semantics<arbitrary>, #tpu.dimension_semantics<arbitrary>], iteration_bounds = array<i64: 2, 2, 2>, scalar_prefetch = 0 : i64, scratch_operands = 2 : i64, tpu.core_type = #tpu.core_type<tc>, window_params = [{transform_indices = @transform_0, window_bounds = array<i64: 256, 128>}, {transform_indices = @transform_1, window_bounds = array<i64: 256, 256>}, {transform_indices = @transform_2, window_bounds = array<i64: 256, 128>}, {pipeline_mode = #tpu.pipeline_mode<synchronous>, transform_indices = @transform_3, window_bounds = array<i64: 1, 128>}, {pipeline_mode = #tpu.pipeline_mode<synchronous>, transform_indices = @transform_4, window_bounds = array<i64: 128, 128>}, {pipeline_mode = #tpu.pipeline_mode<synchronous>, transform_indices = @transform_5, window_bounds = array<i64: 1, 128>}, {transform_indices = @transform_6, window_bounds = array<i64: 256, 128>}]} {
    %c0_i32 = arith.constant 0 : i32
    %0 = arith.cmpi eq, %arg0, %c0_i32 : i32
    %1 = arith.extui %0 : i1 to i32
    %c0_i32_0 = arith.constant 0 : i32
    %2 = arith.cmpi ne, %1, %c0_i32_0 : i32
    scf.if %2 {
      %c0_i32_2 = arith.constant 0 : i32
      %6 = arith.cmpi eq, %arg2, %c0_i32_2 : i32
      %7 = arith.extui %6 : i1 to i32
      %c0_i32_3 = arith.constant 0 : i32
      %8 = arith.cmpi ne, %7, %c0_i32_3 : i32
      scf.if %8 {
        %cst_13 = arith.constant 0.000000e+00 : f32
        %18 = vector.broadcast %cst_13 : f32 to vector<256x128xf32>
        %c0_14 = arith.constant 0 : index
        %c0_15 = arith.constant 0 : index
        %19 = vector.load %arg11[%c0_14, %c0_15] : memref<256x128xf32, #tpu.memory_space<vmem>>, vector<256x128xf32>
        tpu.vector_store %arg11[%c0_14, %c0_15], %18 {strides = array<i32>} : memref<256x128xf32, #tpu.memory_space<vmem>>, vector<256x128xf32>,
      } else {
      }
      %c0 = arith.constant 0 : index
      %c0_4 = arith.constant 0 : index
      %9 = vector.load %arg11[%c0, %c0_4] : memref<256x128xf32, #tpu.memory_space<vmem>>, vector<256x128xf32>
      %c0_5 = arith.constant 0 : index
      %c0_6 = arith.constant 0 : index
      %10 = vector.load %arg4[%c0_5, %c0_6] : memref<256x256xbf16, #tpu.memory_space<vmem>>, vector<256x256xbf16>
      %c0_7 = arith.constant 0 : index
      %c0_8 = arith.constant 0 : index
      %11 = vector.load %arg3[%c0_7, %c0_8] : memref<256x128xbf16, #tpu.memory_space<vmem>>, vector<256x128xbf16>
      %cst = arith.constant dense<0.000000e+00> : vector<256x128xf32>
      %12 = tpu.matmul %10, %11, %cst {dimension_numbers = #tpu.dot_dimension_numbers<[1], [0], [0], [1], [0, 0, 1, 1], [], []>} : vector<256x256xbf16>, vector<256x128xbf16>, vector<256x128xf32> -> vector<256x128xf32>
      %13 = arith.addf %9, %12 : vector<256x128xf32>
      %c0_9 = arith.constant 0 : index
      %c0_10 = arith.constant 0 : index
      %14 = vector.load %arg11[%c0_9, %c0_10] : memref<256x128xf32, #tpu.memory_space<vmem>>, vector<256x128xf32>
      tpu.vector_store %arg11[%c0_9, %c0_10], %13 {strides = array<i32>} : memref<256x128xf32, #tpu.memory_space<vmem>>, vector<256x128xf32>,
      %c1_i32_11 = arith.constant 1 : i32
      %15 = arith.cmpi eq, %arg2, %c1_i32_11 : i32
      %16 = arith.extui %15 : i1 to i32
      %c0_i32_12 = arith.constant 0 : i32
      %17 = arith.cmpi ne, %16, %c0_i32_12 : i32
      scf.if %17 {
        %c0_13 = arith.constant 0 : index
        %c0_14 = arith.constant 0 : index
        %18 = vector.load %arg11[%c0_13, %c0_14] : memref<256x128xf32, #tpu.memory_space<vmem>>, vector<256x128xf32>
        %c0_15 = arith.constant 0 : index
        %c0_16 = arith.constant 0 : index
        %19 = vector.load %arg6[%c0_15, %c0_16] : memref<1x128xf32, #tpu.memory_space<vmem>>, vector<1x128xf32>
        %20 = vector.broadcast %19 : vector<1x128xf32> to vector<256x128xf32>
        %21 = arith.addf %18, %20 : vector<256x128xf32>
        %cst_17 = arith.constant 0.000000e+00 : f32
        %22 = vector.broadcast %cst_17 : f32 to vector<256x128xf32>
        %23 = arith.maximumf %21, %22 : vector<256x128xf32>
        %c0_18 = arith.constant 0 : index
        %c0_19 = arith.constant 0 : index
        %24 = vector.load %arg5[%c0_18, %c0_19] : memref<256x128xbf16, #tpu.memory_space<vmem>>, vector<256x128xbf16>
        %25 = arith.extf %24 : vector<256x128xbf16> to vector<256x128xf32>
        %26 = arith.mulf %23, %25 : vector<256x128xf32>
        %c256_i32 = arith.constant 256 : i32
        %27 = arith.muli %arg1, %c256_i32 : i32
        %28 = tpu.assume_multiple %27, 256 : i32
        %29 = arith.truncf %26 : vector<256x128xf32> to vector<256x128xbf16>
        %c0_20 = arith.constant 0 : index
        %c0_21 = arith.constant 0 : index
        %30 = vector.load %arg7[%c0_20, %c0_21] : memref<128x128xbf16, #tpu.memory_space<vmem>>, vector<128x128xbf16>
        %cst_22 = arith.constant dense<0.000000e+00> : vector<256x128xf32>
        %31 = tpu.matmul %29, %30, %cst_22 {dimension_numbers = #tpu.dot_dimension_numbers<[1], [0], [0], [1], [0, 0, 1, 1], [], []>} : vector<256x128xbf16>, vector<128x128xbf16>, vector<256x128xf32> -> vector<256x128xf32>
        %32 = arith.truncf %31 : vector<256x128xf32> to vector<256x128xbf16>
        %33 = arith.index_cast %28 : i32 to index
        %c0_23 = arith.constant 0 : index
        %34 = vector.load %arg10[%33, %c0_23] : memref<512x128xbf16, #tpu.memory_space<vmem>>, vector<256x128xbf16>
        tpu.vector_store %arg10[%33, %c0_23], %32 {strides = array<i32>} : memref<512x128xbf16, #tpu.memory_space<vmem>>, vector<256x128xbf16>,
      } else {
      }
    } else {
    }
    %c1_i32 = arith.constant 1 : i32
    %3 = arith.cmpi eq, %arg0, %c1_i32 : i32
    %4 = arith.extui %3 : i1 to i32
    %c0_i32_1 = arith.constant 0 : i32
    %5 = arith.cmpi ne, %4, %c0_i32_1 : i32
    scf.if %5 {
      %c0_i32_2 = arith.constant 0 : i32
      %6 = arith.cmpi eq, %arg2, %c0_i32_2 : i32
      %7 = arith.extui %6 : i1 to i32
      %c0_i32_3 = arith.constant 0 : i32
      %8 = arith.cmpi ne, %7, %c0_i32_3 : i32
      scf.if %8 {
        %cst_12 = arith.constant 0.000000e+00 : f32
        %21 = vector.broadcast %cst_12 : f32 to vector<256x128xf32>
        %c0_13 = arith.constant 0 : index
        %c0_14 = arith.constant 0 : index
        %22 = vector.load %arg9[%c0_13, %c0_14] : memref<256x128xf32, #tpu.memory_space<vmem>>, vector<256x128xf32>
        tpu.vector_store %arg9[%c0_13, %c0_14], %21 {strides = array<i32>} : memref<256x128xf32, #tpu.memory_space<vmem>>, vector<256x128xf32>,
      } else {
      }
      %c256_i32 = arith.constant 256 : i32
      %9 = arith.muli %arg2, %c256_i32 : i32
      %10 = tpu.assume_multiple %9, 256 : i32
      %c0 = arith.constant 0 : index
      %c0_4 = arith.constant 0 : index
      %11 = vector.load %arg9[%c0, %c0_4] : memref<256x128xf32, #tpu.memory_space<vmem>>, vector<256x128xf32>
      %c0_5 = arith.constant 0 : index
      %c0_6 = arith.constant 0 : index
      %12 = vector.load %arg4[%c0_5, %c0_6] : memref<256x256xbf16, #tpu.memory_space<vmem>>, vector<256x256xbf16>
      %13 = arith.index_cast %10 : i32 to index
      %c0_7 = arith.constant 0 : index
      %14 = vector.load %arg10[%13, %c0_7] : memref<512x128xbf16, #tpu.memory_space<vmem>>, vector<256x128xbf16>
      %cst = arith.constant dense<0.000000e+00> : vector<256x128xf32>
      %15 = tpu.matmul %12, %14, %cst {dimension_numbers = #tpu.dot_dimension_numbers<[1], [0], [0], [1], [0, 0, 1, 1], [], []>} : vector<256x256xbf16>, vector<256x128xbf16>, vector<256x128xf32> -> vector<256x128xf32>
      %16 = arith.addf %11, %15 : vector<256x128xf32>
      %c0_8 = arith.constant 0 : index
      %c0_9 = arith.constant 0 : index
      %17 = vector.load %arg9[%c0_8, %c0_9] : memref<256x128xf32, #tpu.memory_space<vmem>>, vector<256x128xf32>
      tpu.vector_store %arg9[%c0_8, %c0_9], %16 {strides = array<i32>} : memref<256x128xf32, #tpu.memory_space<vmem>>, vector<256x128xf32>,
      %c1_i32_10 = arith.constant 1 : i32
      %18 = arith.cmpi eq, %arg2, %c1_i32_10 : i32
      %19 = arith.extui %18 : i1 to i32
      %c0_i32_11 = arith.constant 0 : i32
      %20 = arith.cmpi ne, %19, %c0_i32_11 : i32
      scf.if %20 {
        %c0_12 = arith.constant 0 : index
        %c0_13 = arith.constant 0 : index
        %21 = vector.load %arg9[%c0_12, %c0_13] : memref<256x128xf32, #tpu.memory_space<vmem>>, vector<256x128xf32>
        %c0_14 = arith.constant 0 : index
        %c0_15 = arith.constant 0 : index
        %22 = vector.load %arg8[%c0_14, %c0_15] : memref<1x128xf32, #tpu.memory_space<vmem>>, vector<1x128xf32>
        %23 = vector.broadcast %22 : vector<1x128xf32> to vector<256x128xf32>
        %24 = arith.addf %21, %23 : vector<256x128xf32>
        %cst_16 = arith.constant 0.000000e+00 : f32
        %25 = vector.broadcast %cst_16 : f32 to vector<256x128xf32>
        %26 = arith.maximumf %24, %25 : vector<256x128xf32>
        %c0_17 = arith.constant 0 : index
        %c0_18 = arith.constant 0 : index
        %27 = vector.load %arg9[%c0_17, %c0_18] : memref<256x128xf32, #tpu.memory_space<vmem>>, vector<256x128xf32>
        tpu.vector_store %arg9[%c0_17, %c0_18], %26 {strides = array<i32>} : memref<256x128xf32, #tpu.memory_space<vmem>>, vector<256x128xf32>,
      } else {
      }
    } else {
    }
    return
  }
  func.func @transform_0(%arg0: i32, %arg1: i32, %arg2: i32) -> (i32, i32) {
    %c1_i32 = arith.constant 1 : i32
    %0 = arith.subi %c1_i32, %arg0 : i32
    %1 = arith.muli %arg2, %0 : i32
    %c0_i32 = arith.constant 0 : i32
    %c0_i32_0 = arith.constant 0 : i32
    return %1, %c0_i32 : i32, i32
  }
  func.func @transform_1(%arg0: i32, %arg1: i32, %arg2: i32) -> (i32, i32) {
    %c0_i32 = arith.constant 0 : i32
    return %arg1, %arg2 : i32, i32
  }
  func.func @transform_2(%arg0: i32, %arg1: i32, %arg2: i32) -> (i32, i32) {
    %c1_i32 = arith.constant 1 : i32
    %0 = arith.subi %c1_i32, %arg0 : i32
    %1 = arith.muli %arg1, %0 : i32
    %c0_i32 = arith.constant 0 : i32
    %c0_i32_0 = arith.constant 0 : i32
    return %1, %c0_i32 : i32, i32
  }
  func.func @transform_3(%arg0: i32, %arg1: i32, %arg2: i32) -> (i32, i32) {
    %c0_i32 = arith.constant 0 : i32
    %c0_i32_0 = arith.constant 0 : i32
    %c0_i32_1 = arith.constant 0 : i32
    return %c0_i32, %c0_i32_0 : i32, i32
  }
  func.func @transform_4(%arg0: i32, %arg1: i32, %arg2: i32) -> (i32, i32) {
    %c0_i32 = arith.constant 0 : i32
    %c0_i32_0 = arith.constant 0 : i32
    %c0_i32_1 = arith.constant 0 : i32
    return %c0_i32, %c0_i32_0 : i32, i32
  }
  func.func @transform_5(%arg0: i32, %arg1: i32, %arg2: i32) -> (i32, i32) {
    %c0_i32 = arith.constant 0 : i32
    %c0_i32_0 = arith.constant 0 : i32
    %c0_i32_1 = arith.constant 0 : i32
    return %c0_i32, %c0_i32_0 : i32, i32
  }
  func.func @transform_6(%arg0: i32, %arg1: i32, %arg2: i32) -> (i32, i32) {
    %0 = arith.muli %arg1, %arg0 : i32
    %c0_i32 = arith.constant 0 : i32
    %c0_i32_0 = arith.constant 0 : i32
    return %0, %c0_i32 : i32, i32
  }
}

</mosaic_0001>

<bundles_post_ra>
// kernel: tpu_custom_call.1
= control target key start
LH: loop header
LB: loop body
LE: loop exit
PB: predicated region body
PF: predicated region fallthrough
CT: control target
= control target key end

     0   :  { %s4482_s0 = inlined_call_operand.hbm [shape: bf16[512,128], index: 0, kind: input, shape index: {}]   ;;  %s4483_s1 = inlined_call_operand.hbm [shape: bf16[512,512], index: 1, kind: input, shape index: {}]   ;;  %s4484_s2 = inlined_call_operand.hbm [shape: bf16[512,128], index: 2, kind: input, shape index: {}]   ;;  %s4485_s3 = inlined_call_operand.vmem [shape: f32[1,128], index: 3, kind: input, shape index: {}]   ;;  %s4486_s4 = inlined_call_operand.hbm [shape: bf16[128,128], index: 4, kind: input, shape index: {}]   ;;  %s4487_s5 = inlined_call_operand.vmem [shape: f32[1,128], index: 5, kind: input, shape index: {}]   ;;  %s4488_s6 = inlined_call_operand.hbm [shape: f32[512,128], index: 6, kind: output, shape index: {}]  }
   0x1   :  { %4524 = sst [smem:[#allocation37_spill]] %s4483_s1 }
   0x2   :  { %4525 = sst [smem:[#allocation38_spill]] %s4484_s2 }
   0x3   :  { %4526 = sst [smem:[#allocation39_spill]] %s4485_s3 }
   0x4   :  { %4527 = sst [smem:[#allocation40_spill]] %s4486_s4 }
   0x5   :  { %4528 = sst [smem:[#allocation41_spill]] %s4487_s5 }
   0x6   :  { %4529 = sst [smem:[#allocation42_spill]] %s4488_s6 }
   0x7   :  { %11 = vsyncpa [#allocation5], 0 }
   0x8   :  { %13 = vsyncpa [#allocation5 + $0x1], 0 }
   0x9   :  { %14 = vsyncpa [#allocation8], 0 }
   0xa   :  { %16 = vsyncpa [#allocation8 + $0x1], 0 }
   0xb   :  { %17 = vsyncpa [#allocation11], 0 }
   0xc   :  { %18 = vsyncpa [#allocation6], 0 }
   0xd   :  { %20 = vsyncpa [#allocation6 + $0x1], 0  ;;  %s3560_s21 = smov 0   ;;  %s3562_s22 = smov 0  }
   0xe   :  { %s3564_s23 = smov 0   ;;  %s3566_s24 = smov 0  }
   0xf   :  { %s3568_s25 = smov 0   ;;  %s3570_s26 = smov 0  }
  0x10   :  { %s3572_s27 = smov 0   ;;  %s3574_s28 = smov 0  }
  0x11   :  { %s3576_s29 = smov 0   ;;  %s3578_s30 = smov 0  }
  0x12   :  { %s3580_s7 = smov 0   ;;  %s3582_s8 = smov 0  }
  0x13   :  { %s3584_s9 = smov 0   ;;  %s3586_s10 = smov 0  }
  0x14   :  { %s3588_s11 = smov 0   ;;  %s3590_s12 = smov 0  }
  0x15   :  { %s3592_s13 = smov 0   ;;  %s3594_s14 = smov 0  }
  0x16   :  { %s3596_s15 = smov 0  }
  0x17 LB: > { %4530 = sst [smem:[#allocation18_spill]] %s3437_s21  ;;  %p4493_p0 = scmp.eq.s32.totalorder %s3509_s15, 0  ;;  %s3509_s15 = sphi %s3596_s15, %s26_s15   ;;  %s3505_s14 = sphi %s3594_s14, %s4618_s14   ;;  %s3501_s13 = sphi %s3592_s13, %s4631_s13   ;;  %s3497_s12 = sphi %s3590_s12, %s4630_s12   ;;  %s3493_s11 = sphi %s3588_s11, %s4629_s11   ;;  %s3489_s10 = sphi %s3586_s10, %s4628_s10   ;;  %s3485_s9 = sphi %s3584_s9, %s4627_s9   ;;  %s3481_s8 = sphi %s3582_s8, %s4626_s8   ;;  %s3477_s7 = sphi %s3580_s7, %s4625_s7   ;;  %s3473_s30 = sphi %s3578_s30, %s4611_s30   ;;  %s3469_s29 = sphi %s3576_s29, %s4624_s29   ;;  %s3465_s28 = sphi %s3574_s28, %s4623_s28   ;;  %s3461_s27 = sphi %s3572_s27, %s4610_s27   ;;  %s3457_s26 = sphi %s3570_s26, %s4622_s26   ;;  %s3453_s25 = sphi %s3568_s25, %s4621_s25   ;;  %s3449_s24 = sphi %s3566_s24, %s4620_s24   ;;  %s3445_s23 = sphi %s3564_s23, %s4619_s23   ;;  %s3441_s22 = sphi %s3562_s22, %s4617_s22   ;;  %s3437_s21 = sphi %s3560_s21, %s4609_s21  }
  0x18   : > { %4531 = sst [smem:[#allocation19_spill]] %s3441_s22  ;;  %p91_p1 = scmp.ne.s32.totalorder %s3469_s29, %s3465_s28 }
  0x19   : > { %4532 = sst [smem:[#allocation20_spill]] %s3465_s28  ;;  %p97_p2 = scmp.ne.s32.totalorder %s3465_s28, %s3461_s27 }
  0x1a   : > { %4533 = sst [smem:[#allocation21_spill]] %s3477_s7  ;;  %p4492_p3 = scmp.lt.s32.totalorder %s3509_s15, 8 }
  0x1b   : > { %4534 = sst [smem:[#allocation22_spill]] %s3485_s9  ;;  %p93_p4 = por %p91_p1, %p4493_p0 }
  0x1c   : > { %4535 = sst [smem:[#allocation23_spill]] %s3489_s10  ;;  %s284_s17 = sand.u32 1, %s3509_s15  }
  0x1d   : > { %4536 = sst [smem:[#allocation24_spill]] %s3493_s11  ;;  %s286_s18 = sand.u32 1, %s3469_s29  }
  0x1e   : > { %4537 = sst [smem:[#allocation25_spill]] %s3497_s12  ;;  %s2331_s19 = sshll.u32 %s286_s18, 8 }
  0x1f   : > { %4538 = sst [smem:[#allocation26_spill]] %s3501_s13  ;;  %s2333_s20 = sshll.u32 %s3497_s12, 1 }
  0x20   : > { %4539 = sst [smem:[#allocation27_spill]] %s3505_s14  ;;  %s2451_s6 = sshll.u32 %s3501_s13, 7 }
  0x21   : > { %s295_s5 = sadd.s32 %s2451_s6, %s2333_s20  ;;  %s288_s10 = scalar_lea.vmem [#allocation7], %s2331_s19 }
  0x22   : > { %s298_s3 = sshll.u32 %s288_s10, 4  ;;  %s2335_s9 = sshll.u32 %s295_s5, 6  ;;  %s3668_s3 = int_to_ptr.vmem [resolvable:$true] %s298_s3 }
  0x23   : > { %s4540_s1 = sld [smem:[#allocation37_spill]]  ;;  %p3677_p5 = pnand %p4492_p3, %p93_p4 }
  0x24   : > { %s3681_s6 = scalar_lea.sflag [#allocation8], %s284_s17 }
  0x25   : > { %4542 = sst [smem:[#allocation28_spill]] %s3681_s6  ;;  %p3195_p7 = pneg %p3677_p5 }
  0x29   : > { %s3673_s16 = scalar_lea.hbm %s4540_s1, %s2335_s9  ;;  %s3198_s10 = scalar_lea.hbm %s4540_s1, 16384 }
  0x2a   : > { %s3193_s5 = scalar_lea.hbm %s3673_s16, 4096  ;;  %p3199_p10 = scmp.lt.u32.totalorder %s3673_s16, %s4540_s1 }
  0x2b   : > { %p3194_p6 = scmp.ne.s32.totalorder %s3673_s16, %s3193_s5  ;;  %p3200_p11 = scmp.lt.u32.totalorder %s3198_s10, %s3193_s5 }
  0x2c   : > { %p3202_p13 = scmp.lt.u32.totalorder %s3193_s5, %s3673_s16 }
  0x2d   : > { %p3196_p8 = pnand %p3195_p7, %p3194_p6  ;;  %p3201_p12 = por %p3200_p11, %p3199_p10 }
  0x2f   : > { %p3197_p9 = pneg %p3196_p8  ;;  %p3203_p1 = por %p3202_p13, %p3201_p12 }
  0x31   : > { %p3204_p4 = pnand %p3203_p1, %p3197_p9 }
  0x33   : > { %3207 = shalt.err (!%p3204_p4)
}
  0x34   : > { %s3208_s17 = scalar_lea.vmem %s3668_s3, 4096  ;;  %s3511_s20 = smov [#allocation7]  }
  0x35   : > { %p3209_p6 = scmp.ne.s32.totalorder %s3668_s3, %s3208_s17  ;;  %s3213_s2 = sshll.u32 %s3511_s20, 4  ;;  %s3214_s2 = int_to_ptr.vmem [resolvable:$false] %s3213_s2 }
  0x36   : > { %s3215_s9 = scalar_lea.vmem %s3214_s2, 8192  ;;  %p3216_p0 = scmp.lt.s32.totalorder %s3668_s3, %s3214_s2 }
  0x37   : > { %p3211_p8 = pnand %p3209_p6, %p3195_p7  ;;  %p3217_p10 = scmp.lt.s32.totalorder %s3215_s9, %s3208_s17 }
  0x39   : > { %p3212_p3 = pneg %p3211_p8  ;;  %p3218_p11 = por %p3217_p10, %p3216_p0 }
  0x3b   : > { %p3219_p12 = pnand %p3218_p11, %p3212_p3 }
  0x3d   : > { %3222 = shalt.err (!%p3219_p12)
}
  0x3e   : > { %s3512_s5 = smov 256   ;;  %s3513_s10 = smov 128  }
  0x3f   : > { %s3514_s11 = smov 8   ;;  %s3710_s19 = sadd.s32 4294967295, %s3509_s15  }
  0x40   : > { %2899 = dma.hbm_to_vmem [thread:$0]  (!%p3677_p5), %s3673_s16, 4096, %s3668_s3, %s3681_s6, %s3512_s5, %s3513_s10, %s3514_s11  }
  0x41   : > { %4543 = sst [smem:[#allocation29_spill]] %s3710_s19  ;;  %s2324_s17 = sadd.s32 4294967294, %s3509_s15  }
  0x42   : > { %p4496_p0 = scmp.eq.s32.totalorder %s3710_s19, 0  ;;  %p215_p3 = scmp.ne.s32.totalorder %s3445_s23, %s3441_s22 }
  0x43   : > { %p216_p7 = scmp.eq.s32.totalorder %s3710_s19, 7  ;;  %p221_p13 = scmp.ne.s32.totalorder %s3441_s22, %s3437_s21 }
  0x44   : > { %p3723_p9 = por %p97_p2, %p4496_p0  ;;  %p222_p5 = scmp.eq.s32.totalorder %s2324_s17, 7 }
  0x45   : > { %p3729_p1 = por %p216_p7, %p215_p3  ;;  %p2325_p4 = scmp.ge.s32.totalorder %s3509_s15, 1 }
  0x46   : > { %s4544_s2 = scalar_select %p3723_p9, 1, 0 }
  0x47   : > { %s4546_s3 = scalar_select %p3729_p1, 1, 0 }
  0x48   : > { %4545 = sst [smem:[#allocation30_spill]] %s4544_s2  ;;  %p229_p6 = scmp.lt.s32.totalorder %s3509_s15, 9 }
  0x49   : > { %4547 = sst [smem:[#allocation31_spill]] %s4546_s3  ;;  %p3735_p8 = por %p222_p5, %p221_p13 }
  0x4a   : > { %p3739_p10 = pnand %p2325_p4, %p229_p6  ;;  %s3515_s27 = smov [#allocation10]  }
  0x4b   : > { %s4548_s16 = scalar_select %p3735_p8, 1, 0 }
  0x4c   : > { %s4550_s18 = scalar_select %p3739_p10, 1, 0 }
  0x4d   : > { %4549 = sst [smem:[#allocation32_spill]] %s4548_s16  ;;  %s244_s9 = sshll.u32 %s3515_s27, 4  ;;  %s245_s9 = int_to_ptr.vmem [resolvable:$true] %s244_s9 }
  0x4e   : > { %4551 = sst [smem:[#allocation33_spill]] %s4550_s18  ;;  %p2889_p2 = pneg %p3739_p10 }
  0x4f   : > { %s4553_s4 = sld [smem:[#allocation40_spill]] }
  0x50   : > { %p3747_p11 = pnand %p2889_p2, %p4496_p0 }
  0x52   : > { %p3225_p3 = pneg %p3747_p11 }
  0x55   : > { %s3223_s17 = scalar_lea.hbm %s4553_s4, 1024 }
  0x56   : > { %p3224_p12 = scmp.ne.s32.totalorder %s4553_s4, %s3223_s17  ;;  %p3230_p5 = scmp.lt.u32.totalorder %s3223_s17, %s4553_s4 }
  0x58   : > { %p3226_p7 = pnand %p3225_p3, %p3224_p12 }
  0x5a   : > { %p3227_p13 = pneg %p3226_p7 }
  0x5c   : > { %p3232_p4 = pnand %p3230_p5, %p3227_p13 }
  0x5e   : > { %3235 = shalt.err (!%p3232_p4)
}
  0x5f   : > { %s3236_s21 = scalar_lea.vmem %s245_s9, 1024  ;;  %p3244_p8 = scmp.lt.s32.totalorder %s245_s9, %s245_s9 }
  0x60   : > { %p3237_p6 = scmp.ne.s32.totalorder %s245_s9, %s3236_s21  ;;  %p3245_p1 = scmp.lt.s32.totalorder %s3236_s21, %s3236_s21 }
  0x62   : > { %p3239_p2 = pnand %p3237_p6, %p3225_p3  ;;  %p3246_p9 = por %p3245_p1, %p3244_p8 }
  0x64   : > { %p3240_p0 = pneg %p3239_p2 }
  0x66   : > { %p3247_p10 = pnand %p3246_p9, %p3240_p0 }
  0x68   : > { %3250 = shalt.err (!%p3247_p10)
}
  0x69   : > { %s4500_s1 = smov 64   ;;  %s4502_s20 = smov 4  }
  0x6a   : > { %2892 = dma.hbm_to_vmem [thread:$0]  (!%p3747_p11), %s4553_s4, 1024, %s245_s9, [#allocation11], %s4500_s1, %s4500_s1, %s4502_s20  }
  0x6b   : > { %s38_s10 = sadd.s32 1, %s3497_s12  ;;  %s41_s11 = sadd.s32 1, %s3501_s13 }
  0x6c   : > { %p39_p0 = scmp.ge.s32.totalorder %s38_s10, 2  ;;  %s45_s17 = sadd.s32 1, %s3505_s14 }
  0x6d   : > { %s49_s27 = ssub.s32 1, %s3505_s14  ;;  %s56_s21 = sadd.s32 1, %s3481_s8 }
  0x6e   : > { %s4633_s10 = smov (%p39_p0, %s38_s10), 0  ;;  %s4635_s11 = smov (!%p39_p0, %s41_s11), %s3501_s13 }
  0x6f   : > { %4554 = sst [smem:[#allocation34_spill]] %s4633_s10  ;;  %s3778_s5 = smul.u32 %s3497_s12, %s49_s27 }
  0x70   : > { %p43_p9 = scmp.ge.s32.totalorder %s4635_s11, 2  ;;  %p63_p1 = scmp.ne.s32.totalorder %s3481_s8, %s3477_s7 }
  0x71   : > { %p69_p8 = scmp.ne.s32.totalorder %s3477_s7, %s3473_s30  ;;  %s80_s9 = ssub.s32 %s3497_s12, %s4633_s10 }
  0x72   : > { %s4637_s11 = smov (%p43_p9, %s4635_s11), 0  ;;  %s4639_s17 = smov (!%p43_p9, %s45_s17), %s3505_s14 }
  0x73   : > { %p4555_p10 = scmp.eq.s32.totalorder %s3509_s15, 0  ;;  %p4557_p12 = scmp.eq.s32.totalorder %s3710_s19, 0 }
  0x74   : > { %p47_p7 = scmp.ge.s32.totalorder %s4639_s17, 2  ;;  %s79_s30 = ssub.s32 %s3501_s13, %s4637_s11 }
  0x75   : > { %p3792_p11 = por %p4555_p10, %p63_p1  ;;  %p3798_p3 = por %p4557_p12, %p69_p8 }
  0x76   : > { %s81_s20 = sor.u32 %s80_s9, %s79_s30  ;;  %s3805_s4 = smul.u32 %s3501_s13, %s49_s27 }
  0x77   : > { %s4558_s1 = scalar_select %p3798_p3, 1, 0 }
  0x78   : > { %s4641_s17 = smov (%p47_p7, %s4639_s17), 0  ;;  %p82_p13 = scmp.eq.s32.totalorder %s81_s20, 0 }
  0x79   : > { %4559 = sst [smem:[#allocation35_spill]] %s4558_s1  ;;  %s200_s12 = smul.u32 %s3501_s13, %s3505_s14 }
  0x7a   : > { %4560 = sst [smem:[#allocation36_spill]] %s4641_s17  ;;  %s51_s3 = ssub.s32 1, %s4641_s17 }
  0x7b   : > { %s201_s22 = smul.u32 %s4641_s17, %s4637_s11  ;;  %s261_s28 = sand.u32 1, %s3481_s8  }
  0x7c   : > { %s52_s2 = smul.u32 %s51_s3, %s4633_s10  ;;  %s4561_s1 = sadd.s32 1, %s3469_s29 }
  0x7d   : > { %s3819_s9 = scalar_select %p82_p13, %s3469_s29, %s4561_s1  }
  0x7e   : > { %s53_s27 = ssub.s32 %s3778_s5, %s52_s2  ;;  %s110_s30 = smul.u32 %s51_s3, %s4637_s11 }
  0x7f   : > { %p54_p5 = scmp.eq.s32.totalorder %s53_s27, 0  ;;  %s202_s7 = ssub.s32 %s200_s12, %s201_s22 }
  0x80   : > { %s111_s18 = ssub.s32 %s3805_s4, %s110_s30  ;;  %p203_p4 = scmp.eq.s32.totalorder %s202_s7, 0 }
  0x81   : > { %s3825_s6 = scalar_select %p54_p5, %s3481_s8, %s56_s21  }
  0x82   : > { %p3827_p6 = scmp.eq.s32.totalorder %s111_s18, 0  ;;  %s4563_s17 = sadd.s32 1, %s3445_s23 }
  0x83   : > { %s3834_s10 = scalar_select %p203_p4, %s3445_s23, %s4563_s17  }
  0x84   : > { %s2328_s14 = sshll.u32 %s261_s28, 7  ;;  %s2450_s13 = sshll.u32 %s3778_s5, 11 }
  0x85   : > { %s3840_s2 = scalar_lea.hbm %s4482_s0, %s2450_s13  ;;  %s265_s22 = scalar_lea.vmem [#allocation4], %s2328_s14 }
  0x86   : > { %s274_s7 = sshll.u32 %s265_s22, 4  ;;  %p4564_p2 = scmp.lt.s32.totalorder %s3509_s15, 8  ;;  %s3850_s7 = int_to_ptr.vmem [resolvable:$true] %s274_s7 }
  0x87   : > { %s3852_s3 = scalar_lea.sflag [#allocation5], %s261_s28  ;;  %s3251_s13 = scalar_lea.hbm %s3840_s2, 2048 }
  0x88   : > { %p3846_p0 = pnand %p4564_p2, %p3792_p11  ;;  %p3252_p9 = scmp.ne.s32.totalorder %s3840_s2, %s3251_s13 }
  0x89   : > { %s3256_s18 = scalar_lea.hbm %s4482_s0, 4096  ;;  %p3257_p11 = scmp.lt.u32.totalorder %s3840_s2, %s4482_s0 }
  0x8a   : > { %p3253_p1 = pneg %p3846_p0  ;;  %p3258_p12 = scmp.lt.u32.totalorder %s3256_s18, %s3251_s13 }
  0x8b   : > { %p3260_p13 = scmp.lt.u32.totalorder %s3251_s13, %s3840_s2 }
  0x8c   : > { %p3254_p8 = pnand %p3253_p1, %p3252_p9  ;;  %p3259_p7 = por %p3258_p12, %p3257_p11 }
  0x8e   : > { %p3255_p10 = pneg %p3254_p8  ;;  %p3261_p5 = por %p3260_p13, %p3259_p7 }
  0x90   : > { %p3262_p4 = pnand %p3261_p5, %p3255_p10 }
  0x92   : > { %3265 = shalt.err (!%p3262_p4)
}
  0x93   : > { %s3266_s28 = scalar_lea.vmem %s3850_s7, 2048  ;;  %s3518_s21 = smov [#allocation4]  }
  0x94   : > { %p3267_p2 = scmp.ne.s32.totalorder %s3850_s7, %s3266_s28  ;;  %s3271_s16 = sshll.u32 %s3518_s21, 4  ;;  %s3272_s16 = int_to_ptr.vmem [resolvable:$false] %s3271_s16 }
  0x95   : > { %s3273_s27 = scalar_lea.vmem %s3272_s16, 4096  ;;  %p3274_p3 = scmp.lt.s32.totalorder %s3850_s7, %s3272_s16 }
  0x96   : > { %p3269_p9 = pnand %p3267_p2, %p3253_p1  ;;  %p3275_p11 = scmp.lt.s32.totalorder %s3273_s27, %s3266_s28 }
  0x98   : > { %p3270_p8 = pneg %p3269_p9  ;;  %p3276_p12 = por %p3275_p11, %p3274_p3 }
  0x9a   : > { %p3277_p7 = pnand %p3276_p12, %p3270_p8 }
  0x9c   : > { %3280 = shalt.err (!%p3277_p7)
}
  0x9d   : > { %s4566_s30 = smov 4   ;;  %s4567_s1 = smov 64  }
  0x9e   : > { %s4568_s22 = sld [smem:[#allocation29_spill]]  ;;  %s114_s12 = sadd.s32 1, %s3457_s26 }
  0x9f   : > { %2896 = dma.hbm_to_vmem [thread:$0]  (!%p3846_p0), %s3840_s2, 2048, %s3850_s7, %s3852_s3, %s4567_s1, %s4567_s1, %s4566_s30  }
  0xa0   : > { %p121_p3 = scmp.ne.s32.totalorder %s3457_s26, %s3453_s25  ;;  %p4569_p1 = scmp.eq.s32.totalorder %s3509_s15, 0 }
  0xa1   : > { %s3889_s13 = scalar_select %p3827_p6, %s3457_s26, %s114_s12  }
  0xa2   : > { %p123_p10 = por %p121_p3, %p4569_p1  ;;  %p127_p13 = scmp.ne.s32.totalorder %s3453_s25, %s3449_s24 }
  0xa3   : > { %s310_s14 = sand.u32 1, %s3457_s26   ;;  %s2452_s19 = sshll.u32 %s3805_s4, 11 }
  0xa4   : > { %p4570_p5 = scmp.eq.s32.totalorder %s4568_s22, 0  ;;  %s2336_s17 = sshll.u32 %s310_s14, 7 }
  0xa5   : > { %s4572_s21 = sld [smem:[#allocation38_spill]]  ;;  %s312_s20 = scalar_lea.vmem [#allocation9], %s2336_s17 }
  0xa6   : > { %p3899_p4 = por %p127_p13, %p4570_p5  ;;  %s321_s7 = sshll.u32 %s312_s20, 4  ;;  %s3914_s7 = int_to_ptr.vmem [resolvable:$true] %s321_s7 }
  0xa7   : > { %p4574_p6 = scmp.lt.s32.totalorder %s3509_s15, 8 }
  0xa9   : > { %p3910_p0 = pnand %p4574_p6, %p123_p10 }
  0xab   : > { %s4573_s16 = smov %s4572_s21  ;;  %s3906_s2 = scalar_lea.hbm %s4572_s21, %s2452_s19 }
  0xac   : > { %s3281_s24 = scalar_lea.hbm %s3906_s2, 2048  ;;  %p3283_p9 = pneg %p3910_p0 }
  0xad   : > { %p3282_p2 = scmp.ne.s32.totalorder %s3906_s2, %s3281_s24  ;;  %s3286_s22 = scalar_lea.hbm %s4573_s16, 4096 }
  0xae   : > { %p3287_p12 = scmp.lt.u32.totalorder %s3906_s2, %s4573_s16  ;;  %p3288_p7 = scmp.lt.u32.totalorder %s3286_s22, %s3281_s24 }
  0xaf   : > { %p3284_p8 = pnand %p3283_p9, %p3282_p2  ;;  %p3290_p1 = scmp.lt.u32.totalorder %s3281_s24, %s3906_s2 }
  0xb0   : > { %p3289_p3 = por %p3288_p7, %p3287_p12 }
  0xb1   : > { %p3285_p11 = pneg %p3284_p8 }
  0xb2   : > { %p3291_p10 = por %p3290_p1, %p3289_p3 }
  0xb4   : > { %p3292_p13 = pnand %p3291_p10, %p3285_p11 }
  0xb6   : > { %3295 = shalt.err (!%p3292_p13)
}
  0xb7   : > { %s3296_s19 = scalar_lea.vmem %s3914_s7, 2048  ;;  %s3519_s17 = smov [#allocation9]  }
  0xb8   : > { %p3297_p5 = scmp.ne.s32.totalorder %s3914_s7, %s3296_s19  ;;  %s3301_s5 = sshll.u32 %s3519_s17, 4  ;;  %s3302_s5 = int_to_ptr.vmem [resolvable:$false] %s3301_s5 }
  0xb9   : > { %s3303_s28 = scalar_lea.vmem %s3302_s5, 4096  ;;  %p3304_p8 = scmp.lt.s32.totalorder %s3914_s7, %s3302_s5 }
  0xba   : > { %p3299_p6 = pnand %p3297_p5, %p3283_p9  ;;  %p3305_p12 = scmp.lt.s32.totalorder %s3303_s28, %s3296_s19 }
  0xbc   : > { %p3300_p2 = pneg %p3299_p6  ;;  %p3306_p7 = por %p3305_p12, %p3304_p8 }
  0xbe   : > { %p3307_p3 = pnand %p3306_p7, %p3300_p2 }
  0xc0   : > { %3310 = shalt.err (!%p3307_p3)
}
  0xc1   : > { %s4576_s21 = sld [smem:[#allocation28_spill]]  ;;  %s4577_s20 = sld [smem:[#allocation33_spill]] }
  0xc7   : > { %2902 = dma.hbm_to_vmem [thread:$0]  (!%p3910_p0), %s3906_s2, 2048, %s3914_s7, %s4576_s21, %s4567_s1, %s4567_s1, %s4566_s30  }
  0xc8   : > { %p4578_p9 = scmp.ne.s32.totalorder %s4577_s20, 0 }
  0xc9   : > { %s4579_s24 = sld [smem:[#allocation21_spill]] (!%p4578_p9) }
  0xca   : > { %333 = sbr.rel (%p4578_p9) target bundleno = 1217 (0x4c1), region = 44  ;;  %s4580_s3 = sld [smem:[#allocation35_spill]] (!%p4578_p9) }
  0xcf   : > { %s335_s27 = sand.u32 (!%p4578_p9), 1, %s4579_s24  }
  0xd0   : > { %s2340_s22 = sshll.u32 (!%p4578_p9), %s335_s27, 7  ;;  %s336_s12 = scalar_lea.sflag (!%p4578_p9), [#allocation5], %s335_s27 }
  0xd1   : > { %s3948_s14 = scalar_lea.vmem [#allocation4], %s2340_s22  ;;  %p4581_p11 = scmp.ne.s32.totalorder %s4580_s3, 0 }
  0xd3   : > { %3416 = dma.done.wait (%p4581_p11), %s336_s12, 2048  }
  0xd4   : > { %3418 = vsyncadd (%p4581_p11), %s336_s12, 4294965248  ;;  %s4582_s4 = sld [smem:[#allocation29_spill]]  ;;  %s4583_s19 = sld [smem:[#allocation20_spill]] }
  0xd5   : > { %s4584_s17 = sld [smem:[#allocation30_spill]] }
  0xda   : > { %s344_s5 = sand.u32 1, %s4582_s4   ;;  %s346_s30 = sand.u32 1, %s4583_s19  }
  0xdb   : > { %s2341_s1 = sshll.u32 %s346_s30, 8  ;;  %s345_s2 = scalar_lea.sflag [#allocation8], %s344_s5 }
  0xdc   : > { %s3956_s7 = scalar_lea.vmem [#allocation7], %s2341_s1  ;;  %p4585_p0 = scmp.ne.s32.totalorder %s4584_s17, 0 }
  0xde   : > { %3420 = dma.done.wait (%p4585_p0), %s345_s2, 4096  }
  0xdf   : > { %3422 = vsyncadd (%p4585_p0), %s345_s2, 4294963200  ;;  %s355_s28 = sand.u32 1, %s3453_s25  }
  0xe0   : > { %s2342_s21 = sshll.u32 %s355_s28, 7 }
  0xe1   : > { %s3963_s20 = scalar_lea.vmem [#allocation9], %s2342_s21 }
  0xe2   : > { %3424 = dma.done.wait (%p3899_p4), %s345_s2, 2048  }
  0xe3   : > { %3426 = vsyncadd (%p3899_p4), %s345_s2, 4294965248  ;;  %p4586_p1 = scmp.eq.s32.totalorder %s4582_s4, 0 }
  0xe5   : > { %3428 = dma.done.wait (%p4586_p1), [#allocation11], 1024   ;;  %p4587_p10 = pmov %p4586_p1 }
  0xe6   : > { %s4588_s24 = sld [smem:[#allocation19_spill]]  ;;  %s4589_s12 = sld [smem:[#allocation24_spill]] }
  0xe7   : > { %3430 = vsyncadd (%p4587_p10), [#allocation11], 4294966272 }
  0xec   : > { %s397_s3 = sand.u32 1, %s4588_s24   ;;  %p2345_p13 = scmp.ne.s32.totalorder %s4589_s12, 0 }
  0xed   : > { %s2344_s27 = sshll.u32 %s397_s3, 8  ;;  %s4590_s19 = sld [smem:[#allocation22_spill]] (!%p2345_p13) }
  0xee   : > { %s3976_s22 = scalar_lea.vmem [#allocation12], %s2344_s27  ;;  %414 = sbr.rel (%p2345_p13) target bundleno = 824 (0x338), region = 64 }
  0xf3   : > { %p2346_p5 = scmp.ne.s32.totalorder (!%p2345_p13), %s4590_s19, 0 }
  0xf5   : > { %418 = sbr.rel (%p2346_p5) target bundleno = 262 (0x106), region = 68  ;;  %v3520_v0 = vmov (!%p2346_p5), 0.0  }
  0xf6   : > { %419 = vst [vmem:[#allocation3] sm:$0xff] (!%p2346_p5), %v3520_v0  ;;  %420 = vst [vmem:[#allocation3 + $0x8] sm:$0xff] (!%p2346_p5), %v3520_v0 }
  0xf7   : > { %421 = vst [vmem:[#allocation3 + $0x10] sm:$0xff] (!%p2346_p5), %v3520_v0  ;;  %422 = vst [vmem:[#allocation3 + $0x18] sm:$0xff] (!%p2346_p5), %v3520_v0 }
  0xf8   : > { %423 = vst [vmem:[#allocation3 + $0x20] sm:$0xff] (!%p2346_p5), %v3520_v0  ;;  %424 = vst [vmem:[#allocation3 + $0x28] sm:$0xff] (!%p2346_p5), %v3520_v0 }
  0xf9   : > { %425 = vst [vmem:[#allocation3 + $0x30] sm:$0xff] (!%p2346_p5), %v3520_v0  ;;  %426 = vst [vmem:[#allocation3 + $0x38] sm:$0xff] (!%p2346_p5), %v3520_v0 }
  0xfa   : > { %427 = vst [vmem:[#allocation3 + $0x40] sm:$0xff] (!%p2346_p5), %v3520_v0  ;;  %428 = vst [vmem:[#allocation3 + $0x48] sm:$0xff] (!%p2346_p5), %v3520_v0 }
  0xfb   : > { %429 = vst [vmem:[#allocation3 + $0x50] sm:$0xff] (!%p2346_p5), %v3520_v0  ;;  %430 = vst [vmem:[#allocation3 + $0x58] sm:$0xff] (!%p2346_p5), %v3520_v0 }
  0xfc   : > { %431 = vst [vmem:[#allocation3 + $0x60] sm:$0xff] %v3520_v0  ;;  %432 = vst [vmem:[#allocation3 + $0x68] sm:$0xff] %v3520_v0 }
  0xfd   : > { %433 = vst [vmem:[#allocation3 + $0x70] sm:$0xff] %v3520_v0  ;;  %434 = vst [vmem:[#allocation3 + $0x78] sm:$0xff] %v3520_v0 }
  0xfe   : > { %435 = vst [vmem:[#allocation3 + $0x80] sm:$0xff] %v3520_v0  ;;  %436 = vst [vmem:[#allocation3 + $0x88] sm:$0xff] %v3520_v0 }
  0xff   : > { %437 = vst [vmem:[#allocation3 + $0x90] sm:$0xff] %v3520_v0  ;;  %438 = vst [vmem:[#allocation3 + $0x98] sm:$0xff] %v3520_v0 }
 0x100   : > { %439 = vst [vmem:[#allocation3 + $0xa0] sm:$0xff] %v3520_v0  ;;  %440 = vst [vmem:[#allocation3 + $0xa8] sm:$0xff] %v3520_v0 }
 0x101   : > { %441 = vst [vmem:[#allocation3 + $0xb0] sm:$0xff] %v3520_v0  ;;  %442 = vst [vmem:[#allocation3 + $0xb8] sm:$0xff] %v3520_v0 }
 0x102   : > { %443 = vst [vmem:[#allocation3 + $0xc0] sm:$0xff] %v3520_v0  ;;  %444 = vst [vmem:[#allocation3 + $0xc8] sm:$0xff] %v3520_v0 }
 0x103   : > { %445 = vst [vmem:[#allocation3 + $0xd0] sm:$0xff] %v3520_v0  ;;  %446 = vst [vmem:[#allocation3 + $0xd8] sm:$0xff] %v3520_v0 }
 0x104   : > { %447 = vst [vmem:[#allocation3 + $0xe0] sm:$0xff] %v3520_v0  ;;  %448 = vst [vmem:[#allocation3 + $0xe8] sm:$0xff] %v3520_v0 }
 0x105   : > { %449 = vst [vmem:[#allocation3 + $0xf0] sm:$0xff] %v3520_v0  ;;  %450 = vst [vmem:[#allocation3 + $0xf8] sm:$0xff] %v3520_v0 }
 0x106 PF: > { %v3073_v1 = vld [vmem:[%s3948_s14 + $0x40] sm:$0xff]   ;;  %v3075_v3 = vld [vmem:[%s3948_s14 + $0x48] sm:$0xff]   ;;  %v3077_v5 = vld [vmem:[%s3948_s14 + $0x50] sm:$0xff]   ;;  %s4591_s18 = sld [smem:[#allocation22_spill]] }
 0x107   : > { %v3074_v2 = vld [vmem:[%s3948_s14] sm:$0xff]   ;;  %2533 = vmatprep.subr.bf16.mxu0 %v3073_v1  ;;  %2829 = vmatprep.subr.bf16.mxu1 %v3073_v1  ;;  %v3076_v4 = vld [vmem:[%s3948_s14 + $0x8] sm:$0xff]   ;;  %v3078_v6 = vld [vmem:[%s3948_s14 + $0x10] sm:$0xff]  }
 0x108   : > { %2534 = vmatpush3.bf16.msra.mxu0 %v3074_v2  ;;  %2837 = vmatpush3.bf16.msra.mxu1 %v3074_v2  ;;  %v3079_v7 = vld [vmem:[%s3948_s14 + $0x58] sm:$0xff]   ;;  %v3081_v9 = vld [vmem:[%s3948_s14 + $0x60] sm:$0xff]   ;;  %v3083_v11 = vld [vmem:[%s3948_s14 + $0x68] sm:$0xff]  }
 0x109   : > { %2535 = vmatprep.subr.bf16.mxu0 %v3075_v3  ;;  %2830 = vmatprep.subr.bf16.mxu1 %v3075_v3  ;;  %v3080_v8 = vld [vmem:[%s3948_s14 + $0x18] sm:$0xff]   ;;  %v3082_v10 = vld [vmem:[%s3948_s14 + $0x20] sm:$0xff]   ;;  %v3084_v14 = vld [vmem:[%s3948_s14 + $0x28] sm:$0xff]  }
 0x10a   : > { %v3091_v12 = vld [vmem:[%s3956_s7 + $0x4] ss:$8 sps:$4 sm:$0xff]   ;;  %v3085_v15 = vld [vmem:[%s3948_s14 + $0x70] sm:$0xff]   ;;  %v3087_v17 = vld [vmem:[%s3948_s14 + $0x78] sm:$0xff]  }
 0x10b   : > { %v3094_v13 = vld [vmem:[%s3956_s7 + $0x84] ss:$8 sps:$4 sm:$0xff]   ;;  %835 = vmatprep.mubr.bf16.mxu0 %v3091_v12  ;;  %v3086_v16 = vld [vmem:[%s3948_s14 + $0x30] sm:$0xff]   ;;  %v3088_v18 = vld [vmem:[%s3948_s14 + $0x38] sm:$0xff]  }
 0x10c   : > { %2536 = vmatpush3.bf16.msra.mxu0 %v3076_v4  ;;  %2838 = vmatpush3.bf16.msra.mxu1 %v3076_v4  ;;  %v3089_v19 = vld [vmem:[%s3956_s7] ss:$8 sps:$4 sm:$0xff]   ;;  %v3095_v21 = vld [vmem:[%s3956_s7 + $0x14] ss:$8 sps:$4 sm:$0xff]   ;;  %v3099_v23 = vld [vmem:[%s3956_s7 + $0x10] ss:$8 sps:$4 sm:$0xff]  }
 0x10d   : > { %2537 = vmatprep.subr.bf16.mxu0 %v3077_v5  ;;  %2831 = vmatprep.subr.bf16.mxu1 %v3077_v5  ;;  %v3092_v20 = vld [vmem:[%s3956_s7 + $0x80] ss:$8 sps:$4 sm:$0xff]   ;;  %v3097_v22 = vld [vmem:[%s3956_s7 + $0x94] ss:$8 sps:$4 sm:$0xff]   ;;  %v3100_v24 = vld [vmem:[%s3956_s7 + $0x90] ss:$8 sps:$4 sm:$0xff]  }
 0x10e   : > { %899 = vmatprep.mubr.bf16.mxu1 %v3094_v13  ;;  %v3101_v25 = vld [vmem:[%s3956_s7 + $0x24] ss:$8 sps:$4 sm:$0xff]   ;;  %v3105_v27 = vld [vmem:[%s3956_s7 + $0x20] ss:$8 sps:$4 sm:$0xff]   ;;  %v3107_v29 = vld [vmem:[%s3956_s7 + $0x34] ss:$8 sps:$4 sm:$0xff]  }
 0x10f   : > { %v3103_v26 = vld [vmem:[%s3956_s7 + $0xa4] ss:$8 sps:$4 sm:$0xff]   ;;  %v3106_v28 = vld [vmem:[%s3956_s7 + $0xa0] ss:$8 sps:$4 sm:$0xff]   ;;  %v3109_v30 = vld [vmem:[%s3956_s7 + $0xb4] ss:$8 sps:$4 sm:$0xff]  }
 0x110   : > { %2538 = vmatpush3.bf16.msra.mxu0 %v3078_v6  ;;  %2839 = vmatpush3.bf16.msra.mxu1 %v3078_v6  ;;  %v3111_v31 = vld [vmem:[%s3956_s7 + $0x30] ss:$8 sps:$4 sm:$0xff]   ;;  %v3113_v33 = vld [vmem:[%s3956_s7 + $0x44] ss:$8 sps:$4 sm:$0xff]   ;;  %v3117_v35 = vld [vmem:[%s3956_s7 + $0x40] ss:$8 sps:$4 sm:$0xff]  }
 0x111   : > { %2539 = vmatprep.subr.bf16.mxu0 %v3079_v7  ;;  %2832 = vmatprep.subr.bf16.mxu1 %v3079_v7  ;;  %v3112_v32 = vld [vmem:[%s3956_s7 + $0xb0] ss:$8 sps:$4 sm:$0xff]   ;;  %v3115_v34 = vld [vmem:[%s3956_s7 + $0xc4] ss:$8 sps:$4 sm:$0xff]   ;;  %v3118_v36 = vld [vmem:[%s3956_s7 + $0xc0] ss:$8 sps:$4 sm:$0xff]  }
 0x112   : > { %v3119_v37 = vld [vmem:[%s3956_s7 + $0x54] ss:$8 sps:$4 sm:$0xff]   ;;  %v3123_v39 = vld [vmem:[%s3956_s7 + $0x50] ss:$8 sps:$4 sm:$0xff]   ;;  %v3125_v41 = vld [vmem:[%s3956_s7 + $0x64] ss:$8 sps:$4 sm:$0xff]  }
 0x113   : > { %v3121_v38 = vld [vmem:[%s3956_s7 + $0xd4] ss:$8 sps:$4 sm:$0xff]   ;;  %v3124_v40 = vld [vmem:[%s3956_s7 + $0xd0] ss:$8 sps:$4 sm:$0xff]   ;;  %v3127_v42 = vld [vmem:[%s3956_s7 + $0xe4] ss:$8 sps:$4 sm:$0xff]  }
 0x114   : > { %2540 = vmatpush3.bf16.msra.mxu0 %v3080_v8  ;;  %2840 = vmatpush3.bf16.msra.mxu1 %v3080_v8  ;;  %v3129_v43 = vld [vmem:[%s3956_s7 + $0x60] ss:$8 sps:$4 sm:$0xff]   ;;  %v3131_v45 = vld [vmem:[%s3956_s7 + $0x74] ss:$8 sps:$4 sm:$0xff]   ;;  %v3135_v47 = vld [vmem:[%s3956_s7 + $0x70] ss:$8 sps:$4 sm:$0xff]  }
 0x115   : > { %2541 = vmatprep.subr.bf16.mxu0 %v3081_v9  ;;  %2833 = vmatprep.subr.bf16.mxu1 %v3081_v9  ;;  %v3130_v44 = vld [vmem:[%s3956_s7 + $0xe0] ss:$8 sps:$4 sm:$0xff]   ;;  %v3133_v46 = vld [vmem:[%s3956_s7 + $0xf4] ss:$8 sps:$4 sm:$0xff]   ;;  %v3136_v48 = vld [vmem:[%s3956_s7 + $0xf0] ss:$8 sps:$4 sm:$0xff]  }
 0x116   : > { %v451_v51 = vld [vmem:[#allocation3] sm:$0xff]  ;;  %v452_v59 = vld [vmem:[#allocation3 + $0x8] sm:$0xff]  ;;  %v453_v7 = vld [vmem:[#allocation3 + $0x10] sm:$0xff]  ;;  %p2395_p4 = scmp.ne.s32.totalorder %s4591_s18, 1 }
 0x117   : > { %v467_v53 = vld [vmem:[#allocation3 + $0x80] sm:$0xff]  ;;  %v468_v61 = vld [vmem:[#allocation3 + $0x88] sm:$0xff]  ;;  %v469_v9 = vld [vmem:[#allocation3 + $0x90] sm:$0xff]  ;;  %s4592_s17 = sld [smem:[#allocation39_spill]] (!%p2395_p4)  ;;  %s4593_s5 = sld [smem:[#allocation23_spill]] (!%p2395_p4) }
 0x118   : > { %2542 = vmatpush3.bf16.msra.mxu0 %v3082_v10  ;;  %2841 = vmatpush3.bf16.msra.mxu1 %v3082_v10 }
 0x119   : > { %2543 = vmatprep.subr.bf16.mxu0 %v3083_v11  ;;  %2834 = vmatprep.subr.bf16.mxu1 %v3083_v11 }
 0x11c   : > { %2544 = vmatpush3.bf16.msra.mxu0 %v3084_v14  ;;  %2842 = vmatpush3.bf16.msra.mxu1 %v3084_v14 }
 0x11d   : > { %2545 = vmatprep.subr.bf16.mxu0 %v3085_v15  ;;  %2835 = vmatprep.subr.bf16.mxu1 %v3085_v15  ;;  %v454_v15 = vld [vmem:[#allocation3 + $0x18] sm:$0xff]  ;;  %s2397_s30 = sshll.u32 (!%p2395_p4), %s4593_s5, 8 }
 0x11e   : > { %s1489_s1 = sshra.s32 (!%p2395_p4), %s2397_s30, 4 }
 0x11f   : > { %s2406_s2 = sshll.u32 (!%p2395_p4), %s1489_s1, 3 }
 0x120   : > { %2546 = vmatpush3.bf16.msra.mxu0 %v3086_v16  ;;  %2843 = vmatpush3.bf16.msra.mxu1 %v3086_v16  ;;  %s4110_s28 = scalar_lea.vmem (!%p2395_p4), [#allocation2], %s2406_s2 }
 0x121   : > { %2547 = vmatprep.subr.bf16.mxu0 %v3087_v17  ;;  %2836 = vmatprep.subr.bf16.mxu1 %v3087_v17  ;;  %v470_v17 = vld [vmem:[#allocation3 + $0x98] sm:$0xff] }
 0x124   : > { %2548 = vmatpush3.bf16.msra.mxu0 %v3088_v18  ;;  %2844 = vmatpush3.bf16.msra.mxu1 %v3088_v18 }
 0x127   : > { %836 = vmatmul.mubr.bf16.vlgmr.msra.gmra.mrb[0].mxu0 %v3089_v19  ;;  %900 = vmatmul.mubr.bf16.vlgmr.msra.gmra.mrb[0].mxu1 %v3092_v20 }
 0x128   : > { %843 = vmatprep.mubr.bf16.mxu0 %v3095_v21  ;;  %907 = vmatprep.mubr.bf16.mxu1 %v3097_v22 }
 0x12f   : > { %844 = vmatmul.mubr.bf16.gmra.mrb[4].mxu0 %v3099_v23  ;;  %908 = vmatmul.mubr.bf16.gmra.mrb[4].mxu1 %v3100_v24 }
 0x130   : > { %851 = vmatprep.mubr.bf16.mxu0 %v3101_v25  ;;  %915 = vmatprep.mubr.bf16.mxu1 %v3103_v26 }
 0x137   : > { %852 = vmatmul.mubr.bf16.gmra.mrb[8].mxu0 %v3105_v27  ;;  %916 = vmatmul.mubr.bf16.gmra.mrb[8].mxu1 %v3106_v28  ;;  %v455_v27 = vld [vmem:[#allocation3 + $0x20] sm:$0xff] }
 0x138   : > { %859 = vmatprep.mubr.bf16.mxu0 %v3107_v29  ;;  %923 = vmatprep.mubr.bf16.mxu1 %v3109_v30  ;;  %v471_v29 = vld [vmem:[#allocation3 + $0xa0] sm:$0xff] }
 0x13f   : > { %860 = vmatmul.mubr.bf16.gmra.mrb[12].mxu0 %v3111_v31  ;;  %924 = vmatmul.mubr.bf16.gmra.mrb[12].mxu1 %v3112_v32 }
 0x140   : > { %867 = vmatprep.mubr.bf16.mxu0 %v3113_v33  ;;  %931 = vmatprep.mubr.bf16.mxu1 %v3115_v34 }
 0x147   : > { %868 = vmatmul.mubr.bf16.gmra.mrb[16].mxu0 %v3117_v35  ;;  %932 = vmatmul.mubr.bf16.gmra.mrb[16].mxu1 %v3118_v36  ;;  %v456_v35 = vld [vmem:[#allocation3 + $0x28] sm:$0xff] }
 0x148   : > { %875 = vmatprep.mubr.bf16.mxu0 %v3119_v37  ;;  %939 = vmatprep.mubr.bf16.mxu1 %v3121_v38  ;;  %v472_v37 = vld [vmem:[#allocation3 + $0xa8] sm:$0xff] }
 0x14f   : > { %876 = vmatmul.mubr.bf16.gmra.mrb[20].mxu0 %v3123_v39  ;;  %940 = vmatmul.mubr.bf16.gmra.mrb[20].mxu1 %v3124_v40 }
 0x150   : > { %883 = vmatprep.mubr.bf16.mxu0 %v3125_v41  ;;  %947 = vmatprep.mubr.bf16.mxu1 %v3127_v42 }
 0x157   : > { %884 = vmatmul.mubr.bf16.gmra.mrb[24].mxu0 %v3129_v43  ;;  %948 = vmatmul.mubr.bf16.gmra.mrb[24].mxu1 %v3130_v44 }
 0x158   : > { %891 = vmatprep.mubr.bf16.mxu0 %v3131_v45  ;;  %955 = vmatprep.mubr.bf16.mxu1 %v3133_v46 }
 0x15f   : > { %892 = vmatmul.mubr.bf16.gmra.mrb[28].mxu0 %v3135_v47  ;;  %956 = vmatmul.mubr.bf16.gmra.mrb[28].mxu1 %v3136_v48  ;;  %v457_v47 = vld [vmem:[#allocation3 + $0x30] sm:$0xff] }
 0x1fa   : > { %v2549_v49 = vpop.f32.mrb[0].mxu0  ;;  %v2597_v50 = vpop.f32.mrb[0].mxu1 }
 0x1fb   : > { %v2550_v52 = vpop.f32.mrb[1].mxu0  ;;  %v2598_v54 = vpop.f32.mrb[1].mxu1 }
 0x1fc   : > { %v2551_v55 = vadd.f32 %v2550_v52, %v2549_v49  ;;  %v2599_v56 = vadd.f32 %v2598_v54, %v2597_v50  ;;  %v2552_v57 = vpop.f32.mrb[2].mxu0  ;;  %v2600_v58 = vpop.f32.mrb[2].mxu1  ;;  %v473_v49 = vld [vmem:[#allocation3 + $0xb0] sm:$0xff] }
 0x1fd   : > { %v2553_v60 = vpop.f32.mrb[3].mxu0  ;;  %v2601_v62 = vpop.f32.mrb[3].mxu1 }
 0x1fe   : > { %v964_v63 = vadd.f32 %v2551_v55, %v451_v51  ;;  %v980_v0 = vadd.f32 %v2599_v56, %v467_v53  ;;  %v2554_v1 = vadd.f32 %v2553_v60, %v2552_v57  ;;  %v2602_v2 = vadd.f32 %v2601_v62, %v2600_v58  ;;  %v458_v55 = vld [vmem:[#allocation3 + $0x38] sm:$0xff] }
 0x1ff   : > { %v474_v57 = vld [vmem:[#allocation3 + $0xb8] sm:$0xff] }
 0x200   : > { %996 = vst [vmem:[#allocation3] sm:$0xff] %v964_v63  ;;  %1012 = vst [vmem:[#allocation3 + $0x80] sm:$0xff] %v980_v0  ;;  %v965_v3 = vadd.f32 %v2554_v1, %v452_v59  ;;  %v981_v4 = vadd.f32 %v2602_v2, %v468_v61 }
 0x202   : > { %997 = vst [vmem:[#allocation3 + $0x8] sm:$0xff] %v965_v3  ;;  %1013 = vst [vmem:[#allocation3 + $0x88] sm:$0xff] %v981_v4  ;;  %v2555_v5 = vpop.f32.mrb[4].mxu0  ;;  %v2603_v6 = vpop.f32.mrb[4].mxu1  ;;  %v459_v3 = vld [vmem:[#allocation3 + $0x40] sm:$0xff] }
 0x203   : > { %v2556_v8 = vpop.f32.mrb[5].mxu0  ;;  %v2604_v10 = vpop.f32.mrb[5].mxu1 }
 0x204   : > { %v2557_v11 = vadd.f32 %v2556_v8, %v2555_v5  ;;  %v2605_v12 = vadd.f32 %v2604_v10, %v2603_v6  ;;  %v2558_v13 = vpop.f32.mrb[6].mxu0  ;;  %v2606_v14 = vpop.f32.mrb[6].mxu1  ;;  %v475_v5 = vld [vmem:[#allocation3 + $0xc0] sm:$0xff] }
 0x205   : > { %v2559_v16 = vpop.f32.mrb[7].mxu0  ;;  %v2607_v18 = vpop.f32.mrb[7].mxu1 }
 0x206   : > { %v966_v19 = vadd.f32 %v2557_v11, %v453_v7  ;;  %v982_v20 = vadd.f32 %v2605_v12, %v469_v9  ;;  %v2560_v21 = vadd.f32 %v2559_v16, %v2558_v13  ;;  %v2608_v22 = vadd.f32 %v2607_v18, %v2606_v14  ;;  %v460_v11 = vld [vmem:[#allocation3 + $0x48] sm:$0xff] }
 0x207   : > { %v476_v13 = vld [vmem:[#allocation3 + $0xc8] sm:$0xff] }
 0x208   : > { %998 = vst [vmem:[#allocation3 + $0x10] sm:$0xff] %v966_v19  ;;  %1014 = vst [vmem:[#allocation3 + $0x90] sm:$0xff] %v982_v20  ;;  %v967_v23 = vadd.f32 %v2560_v21, %v454_v15  ;;  %v983_v24 = vadd.f32 %v2608_v22, %v470_v17 }
 0x20a   : > { %999 = vst [vmem:[#allocation3 + $0x18] sm:$0xff] %v967_v23  ;;  %1015 = vst [vmem:[#allocation3 + $0x98] sm:$0xff] %v983_v24  ;;  %v2561_v25 = vpop.f32.mrb[8].mxu0  ;;  %v2609_v26 = vpop.f32.mrb[8].mxu1  ;;  %v461_v23 = vld [vmem:[#allocation3 + $0x50] sm:$0xff] }
 0x20b   : > { %v2562_v28 = vpop.f32.mrb[9].mxu0  ;;  %v2610_v30 = vpop.f32.mrb[9].mxu1 }
 0x20c   : > { %v2563_v31 = vadd.f32 %v2562_v28, %v2561_v25  ;;  %v2611_v32 = vadd.f32 %v2610_v30, %v2609_v26  ;;  %v2564_v33 = vpop.f32.mrb[10].mxu0  ;;  %v2612_v34 = vpop.f32.mrb[10].mxu1  ;;  %v477_v25 = vld [vmem:[#allocation3 + $0xd0] sm:$0xff] }
 0x20d   : > { %v2565_v36 = vpop.f32.mrb[11].mxu0  ;;  %v2613_v38 = vpop.f32.mrb[11].mxu1 }
 0x20e   : > { %v968_v39 = vadd.f32 %v2563_v31, %v455_v27  ;;  %v984_v40 = vadd.f32 %v2611_v32, %v471_v29  ;;  %v2566_v41 = vadd.f32 %v2565_v36, %v2564_v33  ;;  %v2614_v42 = vadd.f32 %v2613_v38, %v2612_v34  ;;  %v462_v31 = vld [vmem:[#allocation3 + $0x58] sm:$0xff] }
 0x20f   : > { %v478_v33 = vld [vmem:[#allocation3 + $0xd8] sm:$0xff] }
 0x210   : > { %1000 = vst [vmem:[#allocation3 + $0x20] sm:$0xff] %v968_v39  ;;  %1016 = vst [vmem:[#allocation3 + $0xa0] sm:$0xff] %v984_v40  ;;  %v969_v43 = vadd.f32 %v2566_v41, %v456_v35  ;;  %v985_v44 = vadd.f32 %v2614_v42, %v472_v37 }
 0x212   : > { %1001 = vst [vmem:[#allocation3 + $0x28] sm:$0xff] %v969_v43  ;;  %1017 = vst [vmem:[#allocation3 + $0xa8] sm:$0xff] %v985_v44  ;;  %v2567_v45 = vpop.f32.mrb[12].mxu0  ;;  %v2615_v46 = vpop.f32.mrb[12].mxu1  ;;  %v463_v43 = vld [vmem:[#allocation3 + $0x60] sm:$0xff] }
 0x213   : > { %v2568_v48 = vpop.f32.mrb[13].mxu0  ;;  %v2616_v50 = vpop.f32.mrb[13].mxu1 }
 0x214   : > { %v2569_v51 = vadd.f32 %v2568_v48, %v2567_v45  ;;  %v2617_v52 = vadd.f32 %v2616_v50, %v2615_v46  ;;  %v2570_v53 = vpop.f32.mrb[14].mxu0  ;;  %v2618_v54 = vpop.f32.mrb[14].mxu1  ;;  %v479_v45 = vld [vmem:[#allocation3 + $0xe0] sm:$0xff] }
 0x215   : > { %v2571_v56 = vpop.f32.mrb[15].mxu0  ;;  %v2619_v58 = vpop.f32.mrb[15].mxu1 }
 0x216   : > { %v970_v59 = vadd.f32 %v2569_v51, %v457_v47  ;;  %v986_v60 = vadd.f32 %v2617_v52, %v473_v49  ;;  %v2572_v61 = vadd.f32 %v2571_v56, %v2570_v53  ;;  %v2620_v62 = vadd.f32 %v2619_v58, %v2618_v54  ;;  %v464_v51 = vld [vmem:[#allocation3 + $0x68] sm:$0xff] }
 0x217   : > { %v480_v53 = vld [vmem:[#allocation3 + $0xe8] sm:$0xff] }
 0x218   : > { %1002 = vst [vmem:[#allocation3 + $0x30] sm:$0xff] %v970_v59  ;;  %1018 = vst [vmem:[#allocation3 + $0xb0] sm:$0xff] %v986_v60  ;;  %v971_v63 = vadd.f32 %v2572_v61, %v458_v55  ;;  %v987_v0 = vadd.f32 %v2620_v62, %v474_v57 }
 0x21a   : > { %1003 = vst [vmem:[#allocation3 + $0x38] sm:$0xff] %v971_v63  ;;  %1019 = vst [vmem:[#allocation3 + $0xb8] sm:$0xff] %v987_v0  ;;  %v2573_v1 = vpop.f32.mrb[16].mxu0  ;;  %v2621_v2 = vpop.f32.mrb[16].mxu1  ;;  %v465_v63 = vld [vmem:[#allocation3 + $0x70] sm:$0xff] }
 0x21b   : > { %v2574_v4 = vpop.f32.mrb[17].mxu0  ;;  %v2622_v6 = vpop.f32.mrb[17].mxu1 }
 0x21c   : > { %v2575_v7 = vadd.f32 %v2574_v4, %v2573_v1  ;;  %v2623_v8 = vadd.f32 %v2622_v6, %v2621_v2  ;;  %v2576_v9 = vpop.f32.mrb[18].mxu0  ;;  %v2624_v10 = vpop.f32.mrb[18].mxu1  ;;  %v481_v1 = vld [vmem:[#allocation3 + $0xf0] sm:$0xff] }
 0x21d   : > { %v2577_v12 = vpop.f32.mrb[19].mxu0  ;;  %v2625_v14 = vpop.f32.mrb[19].mxu1 }
 0x21e   : > { %v972_v15 = vadd.f32 %v2575_v7, %v459_v3  ;;  %v988_v16 = vadd.f32 %v2623_v8, %v475_v5  ;;  %v2578_v17 = vadd.f32 %v2577_v12, %v2576_v9  ;;  %v2626_v18 = vadd.f32 %v2625_v14, %v2624_v10  ;;  %v466_v7 = vld [vmem:[#allocation3 + $0x78] sm:$0xff] }
 0x21f   : > { %v482_v9 = vld [vmem:[#allocation3 + $0xf8] sm:$0xff] }
 0x220   : > { %1004 = vst [vmem:[#allocation3 + $0x40] sm:$0xff] %v972_v15  ;;  %1020 = vst [vmem:[#allocation3 + $0xc0] sm:$0xff] %v988_v16  ;;  %v973_v19 = vadd.f32 %v2578_v17, %v460_v11  ;;  %v989_v20 = vadd.f32 %v2626_v18, %v476_v13  ;;  %v3137_v17 = vld [vmem:[#allocation10] sm:$0xff] (!%p2395_p4)   ;;  %v3138_v18 = vld [vmem:[#allocation10 + $0x8] sm:$0xff] (!%p2395_p4)  }
 0x221   : > { %2781 = vmatprep.subr.bf16.mxu0 (!%p2395_p4), %v3137_v17  ;;  %2845 = vmatprep.subr.bf16.mxu1 (!%p2395_p4), %v3137_v17 }
 0x222   : > { %1005 = vst [vmem:[#allocation3 + $0x48] sm:$0xff] %v973_v19  ;;  %1021 = vst [vmem:[#allocation3 + $0xc8] sm:$0xff] %v989_v20  ;;  %v2579_v21 = vpop.f32.mrb[20].mxu0  ;;  %v2627_v22 = vpop.f32.mrb[20].mxu1  ;;  %2782 = vmatpush3.bf16.msra.mxu0 (!%p2395_p4), %v3137_v17  ;;  %2853 = vmatpush3.bf16.msra.mxu1 (!%p2395_p4), %v3137_v17  ;;  %v3139_v19 = vld [vmem:[#allocation10 + $0x10] sm:$0xff] (!%p2395_p4)   ;;  %v3140_v20 = vld [vmem:[#allocation10 + $0x18] sm:$0xff] (!%p2395_p4)  }
 0x223   : > { %v2580_v24 = vpop.f32.mrb[21].mxu0  ;;  %v2628_v26 = vpop.f32.mrb[21].mxu1  ;;  %2783 = vmatprep.subr.bf16.mxu0 (!%p2395_p4), %v3138_v18  ;;  %2846 = vmatprep.subr.bf16.mxu1 (!%p2395_p4), %v3138_v18 }
 0x224   : > { %v2581_v27 = vadd.f32 %v2580_v24, %v2579_v21  ;;  %v2629_v28 = vadd.f32 %v2628_v26, %v2627_v22  ;;  %v2582_v29 = vpop.f32.mrb[22].mxu0  ;;  %v2630_v30 = vpop.f32.mrb[22].mxu1  ;;  %v1032_v21 = vld [vmem:[#allocation3] sm:$0xff] (!%p2395_p4)  ;;  %v1033_v22 = vld [vmem:[#allocation3 + $0x8] sm:$0xff] (!%p2395_p4) }
 0x225   : > { %v2583_v32 = vpop.f32.mrb[23].mxu0  ;;  %v2631_v34 = vpop.f32.mrb[23].mxu1  ;;  %v2455_v26 = vld [vmem:[%s3963_s20] sm:$0xff] (!%p2395_p4)  }
 0x226   : > { %v974_v35 = vadd.f32 %v2581_v27, %v461_v23  ;;  %v990_v36 = vadd.f32 %v2629_v28, %v477_v25  ;;  %v2584_v37 = vadd.f32 %v2583_v32, %v2582_v29  ;;  %v2632_v38 = vadd.f32 %v2631_v34, %v2630_v30  ;;  %2784 = vmatpush3.bf16.msra.mxu0 (!%p2395_p4), %v3138_v18  ;;  %v4032_v23 = vld [vmem:[%s4592_s17] ss:$0 sm:$0xff] (!%p2395_p4)  ;;  %v1049_v28 = vld [vmem:[#allocation3 + $0x88] sm:$0xff] (!%p2395_p4)  ;;  %v1034_v34 = vld [vmem:[#allocation3 + $0x10] sm:$0xff] (!%p2395_p4) }
 0x227   : > { %2854 = vmatpush3.bf16.msra.mxu1 (!%p2395_p4), %v3138_v18  ;;  %2785 = vmatprep.subr.bf16.mxu0 (!%p2395_p4), %v3139_v19  ;;  %v1071_v24 = vadd.f32 (!%p2395_p4), %v4032_v23, %v1032_v21  ;;  %v1072_v25 = vadd.f32 (!%p2395_p4), %v4032_v23, %v1033_v22  ;;  %v1048_v27 = vld [vmem:[#allocation3 + $0x80] sm:$0xff] (!%p2395_p4)  ;;  %v2456_v29 = vunpack.c.l.bf16 (!%p2395_p4), %v2455_v26  ;;  %v2457_v30 = vunpack.c.h.bf16 (!%p2395_p4), %v2455_v26  ;;  %v1054_v26 = vld [vmem:[#allocation3 + $0xb0] sm:$0xff] (!%p2395_p4) }
 0x228   : > { %1006 = vst [vmem:[#allocation3 + $0x50] sm:$0xff] %v974_v35  ;;  %1022 = vst [vmem:[#allocation3 + $0xd0] sm:$0xff] %v990_v36  ;;  %v975_v39 = vadd.f32 %v2584_v37, %v462_v31  ;;  %v991_v40 = vadd.f32 %v2632_v38, %v478_v33  ;;  %2847 = vmatprep.subr.bf16.mxu1 (!%p2395_p4), %v3139_v19  ;;  %v1087_v31 = vadd.f32 (!%p2395_p4), %v4032_v23, %v1048_v27  ;;  %v2525_v33 = vld [vmem:[%s3963_s20 + $0x40] sm:$0xff] (!%p2395_p4)   ;;  %v1035_v35 = vld [vmem:[#allocation3 + $0x18] sm:$0xff] (!%p2395_p4) }
 0x229   : > { %v1088_v32 = vadd.f32 (!%p2395_p4), %v4032_v23, %v1049_v28  ;;  %v3141_v36 = vld [vmem:[#allocation10 + $0x20] sm:$0xff] (!%p2395_p4)   ;;  %v1103_v37 = vmax.f32 (!%p2395_p4), %v1071_v24, 0.0  ;;  %v1104_v38 = vmax.f32 (!%p2395_p4), %v1072_v25, 0.0 }
 0x22a   : > { %1007 = vst [vmem:[#allocation3 + $0x58] sm:$0xff] %v975_v39  ;;  %1023 = vst [vmem:[#allocation3 + $0xd8] sm:$0xff] %v991_v40  ;;  %v2585_v41 = vpop.f32.mrb[24].mxu0  ;;  %v2633_v42 = vpop.f32.mrb[24].mxu1  ;;  %2786 = vmatpush3.bf16.msra.mxu0 (!%p2395_p4), %v3139_v19  ;;  %v2488_v39 = vunpack.c.l.bf16 (!%p2395_p4), %v2525_v33  ;;  %v2489_v40 = vunpack.c.h.bf16 (!%p2395_p4), %v2525_v33 }
 0x22b   : > { %v2586_v44 = vpop.f32.mrb[25].mxu0  ;;  %v2634_v46 = vpop.f32.mrb[25].mxu1  ;;  %2855 = vmatpush3.bf16.msra.mxu1 (!%p2395_p4), %v3139_v19  ;;  %2787 = vmatprep.subr.bf16.mxu0 (!%p2395_p4), %v3140_v20  ;;  %v1039_v19 = vld [vmem:[#allocation3 + $0x38] sm:$0xff] (!%p2395_p4) }
 0x22c   : > { %v2587_v47 = vadd.f32 %v2586_v44, %v2585_v41  ;;  %v2635_v48 = vadd.f32 %v2634_v46, %v2633_v42  ;;  %v2588_v49 = vpop.f32.mrb[26].mxu0  ;;  %v2636_v50 = vpop.f32.mrb[26].mxu1  ;;  %v2518_v41 = vld [vmem:[%s3963_s20 + $0x8] sm:$0xff] (!%p2395_p4)   ;;  %2848 = vmatprep.subr.bf16.mxu1 (!%p2395_p4), %v3140_v20  ;;  %v1119_v42 = vmax.f32 (!%p2395_p4), %v1087_v31, 0.0  ;;  %v1073_v44 = vadd.f32 (!%p2395_p4), %v4032_v23, %v1034_v34  ;;  %v1050_v46 = vld [vmem:[#allocation3 + $0x90] sm:$0xff] (!%p2395_p4)  ;;  %v1055_v31 = vld [vmem:[#allocation3 + $0xb8] sm:$0xff] (!%p2395_p4) }
 0x22d   : > { %v2589_v52 = vpop.f32.mrb[27].mxu0  ;;  %v2637_v54 = vpop.f32.mrb[27].mxu1  ;;  %v1078_v34 = vadd.f32 (!%p2395_p4), %v4032_v23, %v1039_v19 }
 0x22e   : > { %v976_v55 = vadd.f32 %v2587_v47, %v463_v43  ;;  %v992_v56 = vadd.f32 %v2635_v48, %v479_v45  ;;  %v2590_v57 = vadd.f32 %v2589_v52, %v2588_v49  ;;  %v2638_v58 = vadd.f32 %v2637_v54, %v2636_v50  ;;  %v1051_v47 = vld [vmem:[#allocation3 + $0x98] sm:$0xff] (!%p2395_p4)  ;;  %v2526_v48 = vld [vmem:[%s3963_s20 + $0x48] sm:$0xff] (!%p2395_p4)   ;;  %2788 = vmatpush3.bf16.msra.mxu0 (!%p2395_p4), %v3140_v20 }
 0x22f   : > { %v1120_v43 = vmax.f32 (!%p2395_p4), %v1088_v32, 0.0  ;;  %v1074_v45 = vadd.f32 (!%p2395_p4), %v4032_v23, %v1035_v35  ;;  %v1199_v49 = vmul.f32 (!%p2395_p4), %v2456_v29, %v1103_v37  ;;  %v1200_v50 = vmul.f32 (!%p2395_p4), %v2457_v30, %v1104_v38  ;;  %2856 = vmatpush3.bf16.msra.mxu1 (!%p2395_p4), %v3140_v20  ;;  %2789 = vmatprep.subr.bf16.mxu0 (!%p2395_p4), %v3141_v36  ;;  %v3143_v20 = vld [vmem:[#allocation10 + $0x30] sm:$0xff] (!%p2395_p4)   ;;  %v2520_v30 = vld [vmem:[%s3963_s20 + $0x18] sm:$0xff] (!%p2395_p4)   ;;  %v1040_v35 = vld [vmem:[#allocation3 + $0x40] sm:$0xff] (!%p2395_p4) }
 0x230   : > { %1008 = vst [vmem:[#allocation3 + $0x60] sm:$0xff] %v976_v55  ;;  %1024 = vst [vmem:[#allocation3 + $0xe0] sm:$0xff] %v992_v56  ;;  %v977_v59 = vadd.f32 %v2590_v57, %v464_v51  ;;  %v993_v60 = vadd.f32 %v2638_v58, %v480_v53  ;;  %v2460_v51 = vunpack.c.l.bf16 (!%p2395_p4), %v2518_v41  ;;  %v2461_v52 = vunpack.c.h.bf16 (!%p2395_p4), %v2518_v41  ;;  %v1036_v57 = vld [vmem:[#allocation3 + $0x20] sm:$0xff] (!%p2395_p4)  ;;  %v1037_v58 = vld [vmem:[#allocation3 + $0x28] sm:$0xff] (!%p2395_p4)  ;;  %2849 = vmatprep.subr.bf16.mxu1 (!%p2395_p4), %v3141_v36 }
 0x231   : > { %v1215_v53 = vmul.f32 (!%p2395_p4), %v2488_v39, %v1119_v42  ;;  %v1216_v54 = vmul.f32 (!%p2395_p4), %v2489_v40, %v1120_v43  ;;  %v1105_v55 = vmax.f32 (!%p2395_p4), %v1073_v44, 0.0  ;;  %v1106_v56 = vmax.f32 (!%p2395_p4), %v1074_v45, 0.0  ;;  %v2528_v38 = vld [vmem:[%s3963_s20 + $0x58] sm:$0xff] (!%p2395_p4)   ;;  %v1041_v39 = vld [vmem:[#allocation3 + $0x48] sm:$0xff] (!%p2395_p4) }
 0x232   : > { %1009 = vst [vmem:[#allocation3 + $0x68] sm:$0xff] %v977_v59  ;;  %1025 = vst [vmem:[#allocation3 + $0xe8] sm:$0xff] %v993_v60  ;;  %v2591_v61 = vpop.f32.mrb[28].mxu0  ;;  %v2639_v62 = vpop.f32.mrb[28].mxu1  ;;  %v1232_v59 = vpack.c.bf16 (!%p2395_p4), %v1200_v50, %v1199_v49  ;;  %v1089_v60 = vadd.f32 (!%p2395_p4), %v4032_v23, %v1050_v46  ;;  %2790 = vmatpush3.bf16.msra.mxu0 (!%p2395_p4), %v3141_v36  ;;  %v1093_v37 = vadd.f32 (!%p2395_p4), %v4032_v23, %v1054_v26  ;;  %v3144_v40 = vld [vmem:[#allocation10 + $0x38] sm:$0xff] (!%p2395_p4)   ;;  %v2521_v49 = vld [vmem:[%s3963_s20 + $0x20] sm:$0xff] (!%p2395_p4)  }
 0x233   : > { %v2592_v0 = vpop.f32.mrb[29].mxu0  ;;  %v2640_v2 = vpop.f32.mrb[29].mxu1  ;;  %2857 = vmatpush3.bf16.msra.mxu1 (!%p2395_p4), %v3141_v36  ;;  %v2468_v43 = vunpack.c.l.bf16 (!%p2395_p4), %v2520_v30  ;;  %v1094_v44 = vadd.f32 (!%p2395_p4), %v4032_v23, %v1055_v31  ;;  %v1056_v50 = vld [vmem:[#allocation3 + $0xc0] sm:$0xff] (!%p2395_p4)  ;;  %v2530_v31 = vld [vmem:[%s3963_s20 + $0x68] sm:$0xff] (!%p2395_p4)  }
 0x234   : > { %v2593_v3 = vadd.f32 %v2592_v0, %v2591_v61  ;;  %v2641_v4 = vadd.f32 %v2640_v2, %v2639_v62  ;;  %v2594_v5 = vpop.f32.mrb[30].mxu0  ;;  %v2642_v6 = vpop.f32.mrb[30].mxu1  ;;  %1031 = sbr.rel (%p2395_p4) target bundleno = 824 (0x338), region = 72  ;;  %v1090_v61 = vadd.f32 (!%p2395_p4), %v4032_v23, %v1051_v47  ;;  %v2492_v62 = vunpack.c.l.bf16 (!%p2395_p4), %v2526_v48  ;;  %v1052_v0 = vld [vmem:[#allocation3 + $0xa0] sm:$0xff] (!%p2395_p4)  ;;  %2797 = vmatprep.mubr.bf16.mxu0 (!%p2395_p4), %v1232_v59 }
 0x235   : > { %v2595_v8 = vpop.f32.mrb[31].mxu0  ;;  %v2643_v10 = vpop.f32.mrb[31].mxu1  ;;  %v1240_v2 = vpack.c.bf16 (!%p2395_p4), %v1216_v54, %v1215_v53  ;;  %v2469_v47 = vunpack.c.h.bf16 (!%p2395_p4), %v2520_v30  ;;  %v2500_v53 = vunpack.c.l.bf16 (!%p2395_p4), %v2528_v38  ;;  %v1080_v54 = vadd.f32 (!%p2395_p4), %v4032_v23, %v1041_v39 }
 0x236   : > { %v978_v11 = vadd.f32 %v2593_v3, %v465_v63  ;;  %v994_v12 = vadd.f32 %v2641_v4, %v481_v1  ;;  %v2596_v13 = vadd.f32 %v2595_v8, %v2594_v5  ;;  %v2644_v14 = vadd.f32 %v2643_v10, %v2642_v6  ;;  %v2519_v63 = vld [vmem:[%s3963_s20 + $0x10] sm:$0xff] (!%p2395_p4)   ;;  %v3142_v1 = vld [vmem:[#allocation10 + $0x28] sm:$0xff] (!%p2395_p4)  }
 0x237   : > { %v2493_v3 = vunpack.c.h.bf16 (!%p2395_p4), %v2526_v48  ;;  %v1121_v4 = vmax.f32 (!%p2395_p4), %v1089_v60, 0.0  ;;  %v1122_v5 = vmax.f32 (!%p2395_p4), %v1090_v61, 0.0  ;;  %v1075_v6 = vadd.f32 (!%p2395_p4), %v4032_v23, %v1036_v57  ;;  %v1053_v8 = vld [vmem:[#allocation3 + $0xa8] sm:$0xff] (!%p2395_p4)  ;;  %2813 = vmatprep.mubr.bf16.mxu1 (!%p2395_p4), %v1240_v2  ;;  %2791 = vmatprep.subr.bf16.mxu0 (!%p2395_p4), %v3142_v1  ;;  %v1042_v61 = vld [vmem:[#allocation3 + $0x50] sm:$0xff] (!%p2395_p4)  ;;  %v1043_v2 = vld [vmem:[#allocation3 + $0x58] sm:$0xff] (!%p2395_p4) }
 0x238   : > { %1010 = vst [vmem:[#allocation3 + $0x70] sm:$0xff] %v978_v11  ;;  %1026 = vst [vmem:[#allocation3 + $0xf0] sm:$0xff] %v994_v12  ;;  %v979_v15 = vadd.f32 %v2596_v13, %v466_v7  ;;  %v995_v16 = vadd.f32 %v2644_v14, %v482_v9  ;;  %v1076_v7 = vadd.f32 (!%p2395_p4), %v4032_v23, %v1037_v58  ;;  %v2527_v9 = vld [vmem:[%s3963_s20 + $0x50] sm:$0xff] (!%p2395_p4)   ;;  %v2464_v11 = vunpack.c.l.bf16 (!%p2395_p4), %v2519_v63 }
 0x239   : > { %v4050_v10 = vmul.f32 (!%p2395_p4), %v2460_v51, %v1105_v55  ;;  %v2465_v12 = vunpack.c.h.bf16 (!%p2395_p4), %v2519_v63  ;;  %v1091_v13 = vadd.f32 (!%p2395_p4), %v4032_v23, %v1052_v0  ;;  %v1038_v14 = vld [vmem:[#allocation3 + $0x30] sm:$0xff] (!%p2395_p4)  ;;  %v1107_v17 = vmax.f32 (!%p2395_p4), %v1075_v6, 0.0  ;;  %2850 = vmatprep.subr.bf16.mxu1 (!%p2395_p4), %v3142_v1  ;;  %2792 = vmatpush3.bf16.msra.mxu0 (!%p2395_p4), %v3142_v1  ;;  %v1057_v55 = vld [vmem:[#allocation3 + $0xc8] sm:$0xff] (!%p2395_p4) }
 0x23a   : > { %1011 = vst [vmem:[#allocation3 + $0x78] sm:$0xff] %v979_v15  ;;  %1027 = vst [vmem:[#allocation3 + $0xf8] sm:$0xff] %v995_v16  ;;  %v4053_v15 = vmul.f32 (!%p2395_p4), %v2461_v52, %v1106_v56  ;;  %v4055_v16 = vmul.f32 (!%p2395_p4), %v2492_v62, %v1121_v4  ;;  %v1108_v18 = vmax.f32 (!%p2395_p4), %v1076_v7, 0.0  ;;  %v4057_v21 = vmul.f32 (!%p2395_p4), %v2493_v3, %v1122_v5  ;;  %v2529_v56 = vld [vmem:[%s3963_s20 + $0x60] sm:$0xff] (!%p2395_p4)   ;;  %v2522_v7 = vld [vmem:[%s3963_s20 + $0x28] sm:$0xff] (!%p2395_p4)  }
 0x23b   : > { %v1092_v22 = vadd.f32 %v4032_v23, %v1053_v8  ;;  %v1123_v24 = vmax.f32 %v1091_v13, 0.0  ;;  %v2496_v25 = vunpack.c.l.bf16 %v2527_v9  ;;  %v4060_v27 = vmul.f32 %v2464_v11, %v1107_v17  ;;  %2858 = vmatpush3.bf16.msra.mxu1 %v3142_v1  ;;  %2793 = vmatprep.subr.bf16.mxu0 %v3143_v20  ;;  %v1058_v8 = vld [vmem:[#allocation3 + $0xd0] sm:$0xff]  ;;  %v1045_v26 = vld [vmem:[#allocation3 + $0x68] sm:$0xff] }
 0x23c   : > { %v4062_v28 = vmul.f32 %v2465_v12, %v1108_v18  ;;  %v1077_v29 = vadd.f32 %v4032_v23, %v1038_v14  ;;  %v2497_v33 = vunpack.c.h.bf16 %v2527_v9  ;;  %v1233_v36 = vpack.c.bf16 %v4053_v15, %v4050_v10  ;;  %2851 = vmatprep.subr.bf16.mxu1 %v3143_v20  ;;  %v1059_v14 = vld [vmem:[#allocation3 + $0xd8] sm:$0xff] }
 0x23d   : > { %v1124_v32 = vmax.f32 %v1092_v22, 0.0  ;;  %v1241_v41 = vpack.c.bf16 %v4057_v21, %v4055_v16  ;;  %v4073_v42 = vmul.f32 %v2496_v25, %v1123_v24  ;;  %v1079_v48 = vadd.f32 %v4032_v23, %v1040_v35  ;;  %2794 = vmatpush3.bf16.msra.mxu0 %v3143_v20 }
 0x23e   : > { %v1234_v45 = vpack.c.bf16 %v4062_v28, %v4060_v27  ;;  %v1109_v46 = vmax.f32 %v1077_v29, 0.0  ;;  %v1110_v52 = vmax.f32 %v1078_v34, 0.0  ;;  %v1125_v57 = vmax.f32 %v1093_v37, 0.0  ;;  %2795 = vmatprep.subr.bf16.mxu0 %v3144_v40  ;;  %v1060_v34 = vld [vmem:[#allocation3 + $0xe0] sm:$0xff] }
 0x23f   : > { %v1220_v51 = vmul.f32 %v2497_v33, %v1124_v32  ;;  %2859 = vmatpush3.bf16.msra.mxu1 %v3143_v20  ;;  %v1126_v58 = vmax.f32 %v1094_v44, 0.0  ;;  %v2501_v59 = vunpack.c.h.bf16 %v2528_v38  ;;  %v1111_v60 = vmax.f32 %v1079_v48, 0.0  ;;  %v1044_v20 = vld [vmem:[#allocation3 + $0x60] sm:$0xff] }
 0x240   : > { %2852 = vmatprep.subr.bf16.mxu1 %v3144_v40  ;;  %v1112_v62 = vmax.f32 %v1080_v54, 0.0  ;;  %v2472_v63 = vunpack.c.l.bf16 %v2521_v49  ;;  %v2473_v0 = vunpack.c.h.bf16 %v2521_v49  ;;  %v1095_v1 = vadd.f32 %v4032_v23, %v1056_v50 }
 0x241   : > { %v4083_v3 = vmul.f32 %v2468_v43, %v1109_v46  ;;  %v1096_v4 = vadd.f32 %v4032_v23, %v1057_v55  ;;  %v2504_v5 = vunpack.c.l.bf16 %v2529_v56  ;;  %v2505_v6 = vunpack.c.h.bf16 %v2529_v56  ;;  %2796 = vmatpush3.bf16.msra.mxu0 %v3144_v40 }
 0x242   : > { %v1242_v9 = vpack.c.bf16 %v1220_v51, %v4073_v42  ;;  %v1206_v11 = vmul.f32 %v2469_v47, %v1110_v52  ;;  %v1127_v12 = vmax.f32 %v1095_v1, 0.0  ;;  %v1081_v13 = vadd.f32 %v4032_v23, %v1042_v61  ;;  %v1061_v42 = vld [vmem:[#allocation3 + $0xe8] sm:$0xff]  ;;  %v1046_v52 = vld [vmem:[#allocation3 + $0x70] sm:$0xff] }
 0x243   : > { %2860 = vmatpush3.bf16.msra.mxu1 %v3144_v40  ;;  %v1221_v16 = vmul.f32 %v2500_v53, %v1125_v57  ;;  %v1222_v17 = vmul.f32 %v2501_v59, %v1126_v58  ;;  %v1128_v18 = vmax.f32 %v1096_v4, 0.0  ;;  %v1082_v19 = vadd.f32 %v4032_v23, %v1043_v2  ;;  %v2523_v40 = vld [vmem:[%s3963_s20 + $0x30] sm:$0xff]   ;;  %v1047_v53 = vld [vmem:[#allocation3 + $0x78] sm:$0xff] }
 0x244   : > { %v1207_v21 = vmul.f32 %v2472_v63, %v1111_v60  ;;  %v1208_v22 = vmul.f32 %v2473_v0, %v1112_v62  ;;  %v2476_v24 = vunpack.c.l.bf16 %v2522_v7  ;;  %v1097_v25 = vadd.f32 %v4032_v23, %v1058_v8  ;;  %2798 = vmatmul.mubr.bf16.vlgmr.msra.gmra.mrb[0].mxu0 %v1233_v36  ;;  %v2531_v36 = vld [vmem:[%s3963_s20 + $0x70] sm:$0xff]   ;;  %v1063_v59 = vld [vmem:[#allocation3 + $0xf8] sm:$0xff] }
 0x245   : > { %v1223_v27 = vmul.f32 %v2504_v5, %v1127_v12  ;;  %v1224_v28 = vmul.f32 %v2505_v6, %v1128_v18  ;;  %v1113_v29 = vmax.f32 %v1081_v13, 0.0  ;;  %v1098_v30 = vadd.f32 %v4032_v23, %v1059_v14  ;;  %2801 = vmatprep.mubr.bf16.mxu0 %v1234_v45  ;;  %v1062_v58 = vld [vmem:[#allocation3 + $0xf0] sm:$0xff] }
 0x246   : > { %2814 = vmatmul.mubr.bf16.vlgmr.msra.gmra.mrb[0].mxu1 %v1241_v41  ;;  %v1235_v32 = vpack.c.bf16 %v1206_v11, %v4083_v3  ;;  %v1083_v33 = vadd.f32 %v4032_v23, %v1044_v20  ;;  %v1243_v35 = vpack.c.bf16 %v1222_v17, %v1221_v16  ;;  %v1114_v37 = vmax.f32 %v1082_v19, 0.0  ;;  %v2524_v3 = vld [vmem:[%s3963_s20 + $0x38] sm:$0xff]  }
 0x247   : > { %2817 = vmatprep.mubr.bf16.mxu1 %v1242_v9  ;;  %v2477_v38 = vunpack.c.h.bf16 %v2522_v7  ;;  %v1084_v39 = vadd.f32 %v4032_v23, %v1045_v26  ;;  %v1129_v43 = vmax.f32 %v1097_v25, 0.0  ;;  %v1130_v44 = vmax.f32 %v1098_v30, 0.0  ;;  %v2532_v9 = vld [vmem:[%s3963_s20 + $0x78] sm:$0xff]  }
 0x248   : > { %v2508_v10 = vunpack.c.l.bf16 %v2530_v31  ;;  %v2509_v15 = vunpack.c.h.bf16 %v2530_v31  ;;  %v1236_v41 = vpack.c.bf16 %v1208_v22, %v1207_v21  ;;  %v1244_v46 = vpack.c.bf16 %v1224_v28, %v1223_v27 }
 0x249   : > { %v1209_v47 = vmul.f32 %v2476_v24, %v1113_v29  ;;  %v1099_v48 = vadd.f32 %v4032_v23, %v1060_v34  ;;  %v1115_v49 = vmax.f32 %v1083_v33, 0.0  ;;  %v2480_v45 = vunpack.c.l.bf16 %v2523_v40 }
 0x24a   : > { %v2481_v50 = vunpack.c.h.bf16 %v2523_v40  ;;  %v1100_v51 = vadd.f32 %v4032_v23, %v1061_v42  ;;  %v1116_v54 = vmax.f32 %v1084_v39, 0.0  ;;  %v2512_v56 = vunpack.c.l.bf16 %v2531_v36 }
 0x24b   : > { %v1131_v55 = vmax.f32 %v1099_v48, 0.0  ;;  %v2513_v57 = vunpack.c.h.bf16 %v2531_v36  ;;  %v1210_v60 = vmul.f32 %v2477_v38, %v1114_v37  ;;  %v1225_v61 = vmul.f32 %v2508_v10, %v1129_v43 }
 0x24c   : > { %v1226_v62 = vmul.f32 %v2509_v15, %v1130_v44  ;;  %v1132_v63 = vmax.f32 %v1100_v51, 0.0  ;;  %v1085_v0 = vadd.f32 %v4032_v23, %v1046_v52  ;;  %v1086_v1 = vadd.f32 %v4032_v23, %v1047_v53  ;;  %2802 = vmatmul.mubr.bf16.gmra.mrb[4].mxu0 %v1235_v32 }
 0x24d   : > { %v1211_v2 = vmul.f32 %v2480_v45, %v1115_v49  ;;  %v1101_v4 = vadd.f32 %v4032_v23, %v1062_v58  ;;  %v1102_v5 = vadd.f32 %v4032_v23, %v1063_v59  ;;  %2805 = vmatprep.mubr.bf16.mxu0 %v1236_v41  ;;  %v1212_v6 = vmul.f32 %v2481_v50, %v1116_v54 }
 0x24e   : > { %2818 = vmatmul.mubr.bf16.gmra.mrb[4].mxu1 %v1243_v35  ;;  %v1227_v7 = vmul.f32 %v2512_v56, %v1131_v55  ;;  %v1228_v8 = vmul.f32 %v2513_v57, %v1132_v63  ;;  %v1237_v11 = vpack.c.bf16 %v1210_v60, %v1209_v47  ;;  %v1245_v12 = vpack.c.bf16 %v1226_v62, %v1225_v61 }
 0x24f   : > { %2821 = vmatprep.mubr.bf16.mxu1 %v1244_v46  ;;  %v1117_v13 = vmax.f32 %v1085_v0, 0.0  ;;  %v1118_v14 = vmax.f32 %v1086_v1, 0.0  ;;  %v2484_v16 = vunpack.c.l.bf16 %v2524_v3  ;;  %v2485_v17 = vunpack.c.h.bf16 %v2524_v3 }
 0x250   : > { %v1133_v18 = vmax.f32 %v1101_v4, 0.0  ;;  %v1134_v19 = vmax.f32 %v1102_v5, 0.0  ;;  %v2516_v20 = vunpack.c.l.bf16 %v2532_v9  ;;  %v2517_v21 = vunpack.c.h.bf16 %v2532_v9 }
 0x251   : > { %v1238_v22 = vpack.c.bf16 %v1212_v6, %v1211_v2  ;;  %v1246_v24 = vpack.c.bf16 %v1228_v8, %v1227_v7  ;;  %v1213_v23 = vmul.f32 %v2484_v16, %v1117_v13  ;;  %v1214_v25 = vmul.f32 %v2485_v17, %v1118_v14 }
 0x252   : > { %v1229_v26 = vmul.f32 %v2516_v20, %v1133_v18  ;;  %v1230_v27 = vmul.f32 %v2517_v21, %v1134_v19 }
 0x253   : > { %v1239_v28 = vpack.c.bf16 %v1214_v25, %v1213_v23 }
 0x254   : > { %2806 = vmatmul.mubr.bf16.gmra.mrb[8].mxu0 %v1237_v11  ;;  %v1247_v29 = vpack.c.bf16 %v1230_v27, %v1229_v26 }
 0x255   : > { %2809 = vmatprep.mubr.bf16.mxu0 %v1238_v22 }
 0x256   : > { %2822 = vmatmul.mubr.bf16.gmra.mrb[8].mxu1 %v1245_v12 }
 0x257   : > { %2825 = vmatprep.mubr.bf16.mxu1 %v1246_v24 }
 0x25c   : > { %2810 = vmatmul.mubr.bf16.gmra.mrb[12].mxu0 %v1239_v28 }
 0x25e   : > { %2826 = vmatmul.mubr.bf16.gmra.mrb[12].mxu1 %v1247_v29 }
 0x317   : > { %v2799_v30 = vpop.f32.mrb[0].mxu0 }
 0x318   : > { %v1346_v32 = vpop.f32.mrb[1].mxu0 }
 0x319   : > { %v2815_v31 = vpop.f32.mrb[0].mxu1  ;;  %v2800_v34 = vpop.f32.mrb[2].mxu0 }
 0x31a   : > { %v1410_v33 = vpop.f32.mrb[1].mxu1  ;;  %v1474_v37 = vpack.c.bf16 %v2800_v34, %v2799_v30  ;;  %v1349_v39 = vpop.f32.mrb[3].mxu0 }
 0x31b   : > { %v2816_v35 = vpop.f32.mrb[2].mxu1  ;;  %v1473_v42 = vpack.c.bf16 %v1349_v39, %v1346_v32 }
 0x31c   : > { %v1482_v38 = vpack.c.bf16 %v2816_v35, %v2815_v31  ;;  %v1413_v40 = vpop.f32.mrb[3].mxu1  ;;  %1494 = vst [vmem:[%s4110_s28 + $0x8] sm:$0xff] %v1474_v37 }
 0x31d   : > { %v1481_v43 = vpack.c.bf16 %v1413_v40, %v1410_v33  ;;  %1493 = vst [vmem:[%s4110_s28] sm:$0xff] %v1473_v42 }
 0x31e   : > { %1502 = vst [vmem:[%s4110_s28 + $0x48] sm:$0xff] %v1482_v38 }
 0x31f   : > { %1501 = vst [vmem:[%s4110_s28 + $0x40] sm:$0xff] %v1481_v43  ;;  %v2803_v44 = vpop.f32.mrb[4].mxu0 }
 0x320   : > { %v1362_v15 = vpop.f32.mrb[5].mxu0 }
 0x321   : > { %v2819_v10 = vpop.f32.mrb[4].mxu1  ;;  %v2804_v41 = vpop.f32.mrb[6].mxu0 }
 0x322   : > { %v1426_v36 = vpop.f32.mrb[5].mxu1  ;;  %v1476_v47 = vpack.c.bf16 %v2804_v41, %v2803_v44  ;;  %v1365_v49 = vpop.f32.mrb[7].mxu0 }
 0x323   : > { %v2820_v46 = vpop.f32.mrb[6].mxu1  ;;  %v1475_v50 = vpack.c.bf16 %v1365_v49, %v1362_v15 }
 0x324   : > { %v1484_v48 = vpack.c.bf16 %v2820_v46, %v2819_v10  ;;  %v1429_v45 = vpop.f32.mrb[7].mxu1  ;;  %1496 = vst [vmem:[%s4110_s28 + $0x18] sm:$0xff] %v1476_v47 }
 0x325   : > { %v1483_v51 = vpack.c.bf16 %v1429_v45, %v1426_v36  ;;  %1495 = vst [vmem:[%s4110_s28 + $0x10] sm:$0xff] %v1475_v50 }
 0x326   : > { %1504 = vst [vmem:[%s4110_s28 + $0x58] sm:$0xff] %v1484_v48 }
 0x327   : > { %1503 = vst [vmem:[%s4110_s28 + $0x50] sm:$0xff] %v1483_v51  ;;  %v2807_v52 = vpop.f32.mrb[8].mxu0 }
 0x328   : > { %v1378_v54 = vpop.f32.mrb[9].mxu0 }
 0x329   : > { %v2823_v53 = vpop.f32.mrb[8].mxu1  ;;  %v2808_v56 = vpop.f32.mrb[10].mxu0 }
 0x32a   : > { %v1442_v55 = vpop.f32.mrb[9].mxu1  ;;  %v1478_v58 = vpack.c.bf16 %v2808_v56, %v2807_v52  ;;  %v1381_v60 = vpop.f32.mrb[11].mxu0 }
 0x32b   : > { %v2824_v57 = vpop.f32.mrb[10].mxu1  ;;  %v1477_v62 = vpack.c.bf16 %v1381_v60, %v1378_v54 }
 0x32c   : > { %v1486_v59 = vpack.c.bf16 %v2824_v57, %v2823_v53  ;;  %v1445_v61 = vpop.f32.mrb[11].mxu1  ;;  %1498 = vst [vmem:[%s4110_s28 + $0x28] sm:$0xff] %v1478_v58 }
 0x32d   : > { %v1485_v63 = vpack.c.bf16 %v1445_v61, %v1442_v55  ;;  %1497 = vst [vmem:[%s4110_s28 + $0x20] sm:$0xff] %v1477_v62 }
 0x32e   : > { %1506 = vst [vmem:[%s4110_s28 + $0x68] sm:$0xff] %v1486_v59 }
 0x32f   : > { %1505 = vst [vmem:[%s4110_s28 + $0x60] sm:$0xff] %v1485_v63  ;;  %v2811_v0 = vpop.f32.mrb[12].mxu0 }
 0x330   : > { %v1394_v2 = vpop.f32.mrb[13].mxu0 }
 0x331   : > { %v2827_v1 = vpop.f32.mrb[12].mxu1  ;;  %v2812_v4 = vpop.f32.mrb[14].mxu0 }
 0x332   : > { %v1458_v3 = vpop.f32.mrb[13].mxu1  ;;  %v1480_v6 = vpack.c.bf16 %v2812_v4, %v2811_v0  ;;  %v1397_v8 = vpop.f32.mrb[15].mxu0 }
 0x333   : > { %v2828_v5 = vpop.f32.mrb[14].mxu1  ;;  %v1479_v11 = vpack.c.bf16 %v1397_v8, %v1394_v2 }
 0x334   : > { %v1488_v7 = vpack.c.bf16 %v2828_v5, %v2827_v1  ;;  %v1461_v9 = vpop.f32.mrb[15].mxu1  ;;  %1500 = vst [vmem:[%s4110_s28 + $0x38] sm:$0xff] %v1480_v6 }
 0x335   : > { %v1487_v12 = vpack.c.bf16 %v1461_v9, %v1458_v3  ;;  %1499 = vst [vmem:[%s4110_s28 + $0x30] sm:$0xff] %v1479_v11 }
 0x336   : > { %1508 = vst [vmem:[%s4110_s28 + $0x78] sm:$0xff] %v1488_v7 }
 0x337   : > { %1507 = vst [vmem:[%s4110_s28 + $0x70] sm:$0xff] %v1487_v12 }
 0x338 PF: > { %s4594_s21 = sld [smem:[#allocation24_spill]] }
 0x33e   : > { %p2407_p6 = scmp.ne.s32.totalorder %s4594_s21, 1 }
 0x33f   : > { %s4595_s20 = sld [smem:[#allocation22_spill]] (!%p2407_p6) }
 0x340   : > { %1512 = sbr.rel (%p2407_p6) target bundleno = 1188 (0x4a4), region = 76 }
 0x345   : > { %p2408_p2 = scmp.ne.s32.totalorder (!%p2407_p6), %s4595_s20, 0 }
 0x347   : > { %1516 = sbr.rel (%p2408_p2) target bundleno = 856 (0x358), region = 80  ;;  %v3521_v13 = vmov (!%p2408_p2), 0.0  }
 0x348   : > { %1517 = vst [vmem:[%s3976_s22] sm:$0xff] (!%p2408_p2), %v3521_v13  ;;  %1518 = vst [vmem:[%s3976_s22 + $0x8] sm:$0xff] (!%p2408_p2), %v3521_v13 }
 0x349   : > { %1519 = vst [vmem:[%s3976_s22 + $0x10] sm:$0xff] (!%p2408_p2), %v3521_v13  ;;  %1520 = vst [vmem:[%s3976_s22 + $0x18] sm:$0xff] (!%p2408_p2), %v3521_v13 }
 0x34a   : > { %1521 = vst [vmem:[%s3976_s22 + $0x20] sm:$0xff] (!%p2408_p2), %v3521_v13  ;;  %1522 = vst [vmem:[%s3976_s22 + $0x28] sm:$0xff] (!%p2408_p2), %v3521_v13 }
 0x34b   : > { %1523 = vst [vmem:[%s3976_s22 + $0x30] sm:$0xff] (!%p2408_p2), %v3521_v13  ;;  %1524 = vst [vmem:[%s3976_s22 + $0x38] sm:$0xff] (!%p2408_p2), %v3521_v13 }
 0x34c   : > { %1525 = vst [vmem:[%s3976_s22 + $0x40] sm:$0xff] (!%p2408_p2), %v3521_v13  ;;  %1526 = vst [vmem:[%s3976_s22 + $0x48] sm:$0xff] (!%p2408_p2), %v3521_v13 }
 0x34d   : > { %1527 = vst [vmem:[%s3976_s22 + $0x50] sm:$0xff] (!%p2408_p2), %v3521_v13  ;;  %1528 = vst [vmem:[%s3976_s22 + $0x58] sm:$0xff] (!%p2408_p2), %v3521_v13 }
 0x34e   : > { %1529 = vst [vmem:[%s3976_s22 + $0x60] sm:$0xff] %v3521_v13  ;;  %1530 = vst [vmem:[%s3976_s22 + $0x68] sm:$0xff] %v3521_v13 }
 0x34f   : > { %1531 = vst [vmem:[%s3976_s22 + $0x70] sm:$0xff] %v3521_v13  ;;  %1532 = vst [vmem:[%s3976_s22 + $0x78] sm:$0xff] %v3521_v13 }
 0x350   : > { %1533 = vst [vmem:[%s3976_s22 + $0x80] sm:$0xff] %v3521_v13  ;;  %1534 = vst [vmem:[%s3976_s22 + $0x88] sm:$0xff] %v3521_v13 }
 0x351   : > { %1535 = vst [vmem:[%s3976_s22 + $0x90] sm:$0xff] %v3521_v13  ;;  %1536 = vst [vmem:[%s3976_s22 + $0x98] sm:$0xff] %v3521_v13 }
 0x352   : > { %1537 = vst [vmem:[%s3976_s22 + $0xa0] sm:$0xff] %v3521_v13  ;;  %1538 = vst [vmem:[%s3976_s22 + $0xa8] sm:$0xff] %v3521_v13 }
 0x353   : > { %1539 = vst [vmem:[%s3976_s22 + $0xb0] sm:$0xff] %v3521_v13  ;;  %1540 = vst [vmem:[%s3976_s22 + $0xb8] sm:$0xff] %v3521_v13 }
 0x354   : > { %1541 = vst [vmem:[%s3976_s22 + $0xc0] sm:$0xff] %v3521_v13  ;;  %1542 = vst [vmem:[%s3976_s22 + $0xc8] sm:$0xff] %v3521_v13 }
 0x355   : > { %1543 = vst [vmem:[%s3976_s22 + $0xd0] sm:$0xff] %v3521_v13  ;;  %1544 = vst [vmem:[%s3976_s22 + $0xd8] sm:$0xff] %v3521_v13 }
 0x356   : > { %1545 = vst [vmem:[%s3976_s22 + $0xe0] sm:$0xff] %v3521_v13  ;;  %1546 = vst [vmem:[%s3976_s22 + $0xe8] sm:$0xff] %v3521_v13 }
 0x357   : > { %1547 = vst [vmem:[%s3976_s22 + $0xf0] sm:$0xff] %v3521_v13  ;;  %1548 = vst [vmem:[%s3976_s22 + $0xf8] sm:$0xff] %v3521_v13 }
 0x358 PF: > { %s4596_s24 = sld [smem:[#allocation22_spill]]  ;;  %v3147_v14 = vld [vmem:[%s3956_s7 + $0x4] ss:$8 sps:$4 sm:$0xff]   ;;  %v3145_v33 = vld [vmem:[%s3956_s7] ss:$8 sps:$4 sm:$0xff]  }
 0x359   : > { %v3150_v16 = vld [vmem:[%s3956_s7 + $0x84] ss:$8 sps:$4 sm:$0xff]   ;;  %1826 = vmatprep.mubr.bf16.mxu0 %v3147_v14  ;;  %v3148_v34 = vld [vmem:[%s3956_s7 + $0x80] ss:$8 sps:$4 sm:$0xff]   ;;  %v3151_v35 = vld [vmem:[%s3956_s7 + $0x14] ss:$8 sps:$4 sm:$0xff]  }
 0x35a   : > { %1890 = vmatprep.mubr.bf16.mxu1 %v3150_v16  ;;  %v3153_v37 = vld [vmem:[%s3956_s7 + $0x94] ss:$8 sps:$4 sm:$0xff]   ;;  %v3155_v38 = vld [vmem:[%s3956_s7 + $0x10] ss:$8 sps:$4 sm:$0xff]   ;;  %v3157_v40 = vld [vmem:[%s3956_s7 + $0x24] ss:$8 sps:$4 sm:$0xff]  }
 0x35b   : > { %v3156_v39 = vld [vmem:[%s3956_s7 + $0x90] ss:$8 sps:$4 sm:$0xff]   ;;  %v3159_v42 = vld [vmem:[%s3956_s7 + $0xa4] ss:$8 sps:$4 sm:$0xff]   ;;  %v3161_v43 = vld [vmem:[%s3956_s7 + $0x20] ss:$8 sps:$4 sm:$0xff]  }
 0x35c   : > { %v3162_v44 = vld [vmem:[%s3956_s7 + $0xa0] ss:$8 sps:$4 sm:$0xff]   ;;  %v3163_v10 = vld [vmem:[%s3956_s7 + $0x34] ss:$8 sps:$4 sm:$0xff]   ;;  %v3167_v36 = vld [vmem:[%s3956_s7 + $0x30] ss:$8 sps:$4 sm:$0xff]  }
 0x35d   : > { %v3165_v15 = vld [vmem:[%s3956_s7 + $0xb4] ss:$8 sps:$4 sm:$0xff]   ;;  %v3168_v41 = vld [vmem:[%s3956_s7 + $0xb0] ss:$8 sps:$4 sm:$0xff]   ;;  %v3169_v46 = vld [vmem:[%s3956_s7 + $0x44] ss:$8 sps:$4 sm:$0xff]  }
 0x35e   : > { %s2409_s27 = sshll.u32 %s4596_s24, 8  ;;  %v3171_v47 = vld [vmem:[%s3956_s7 + $0xc4] ss:$8 sps:$4 sm:$0xff]   ;;  %v3173_v48 = vld [vmem:[%s3956_s7 + $0x40] ss:$8 sps:$4 sm:$0xff]   ;;  %p2443_p8 = scmp.ne.s32.totalorder %s4596_s24, 1 }
 0x35f   : > { %s1614_s12 = sshra.s32 %s2409_s27, 4  ;;  %v3174_v49 = vld [vmem:[%s3956_s7 + $0xc0] ss:$8 sps:$4 sm:$0xff]   ;;  %v3175_v45 = vld [vmem:[%s3956_s7 + $0x54] ss:$8 sps:$4 sm:$0xff]   ;;  %s4597_s4 = sld [smem:[#allocation41_spill]] (!%p2443_p8) }
 0x360   : > { %s2410_s19 = sshll.u32 %s1614_s12, 3  ;;  %v3177_v50 = vld [vmem:[%s3956_s7 + $0xd4] ss:$8 sps:$4 sm:$0xff]   ;;  %v3179_v51 = vld [vmem:[%s3956_s7 + $0x50] ss:$8 sps:$4 sm:$0xff]   ;;  %v1550_v63 = vld [vmem:[%s3976_s22] sm:$0xff] }
 0x361   : > { %s4165_s18 = scalar_lea.vmem [#allocation2], %s2410_s19  ;;  %v3180_v52 = vld [vmem:[%s3956_s7 + $0xd0] ss:$8 sps:$4 sm:$0xff]   ;;  %v3181_v53 = vld [vmem:[%s3956_s7 + $0x64] ss:$8 sps:$4 sm:$0xff]  }
 0x362   : > { %v1626_v17 = vld [vmem:[%s4165_s18 + $0x40] sm:$0xff]  ;;  %v1627_v19 = vld [vmem:[%s4165_s18 + $0x48] sm:$0xff]  ;;  %v1628_v21 = vld [vmem:[%s4165_s18 + $0x50] sm:$0xff] }
 0x363   : > { %v1618_v18 = vld [vmem:[%s4165_s18] sm:$0xff]  ;;  %2669 = vmatprep.subr.bf16.mxu0 %v1626_v17  ;;  %2861 = vmatprep.subr.bf16.mxu1 %v1626_v17  ;;  %v1619_v20 = vld [vmem:[%s4165_s18 + $0x8] sm:$0xff]  ;;  %v1620_v22 = vld [vmem:[%s4165_s18 + $0x10] sm:$0xff] }
 0x364   : > { %2670 = vmatpush3.bf16.msra.mxu0 %v1618_v18  ;;  %2869 = vmatpush3.bf16.msra.mxu1 %v1618_v18  ;;  %v1629_v24 = vld [vmem:[%s4165_s18 + $0x58] sm:$0xff]  ;;  %v1630_v25 = vld [vmem:[%s4165_s18 + $0x60] sm:$0xff]  ;;  %v1631_v27 = vld [vmem:[%s4165_s18 + $0x68] sm:$0xff] }
 0x365   : > { %2671 = vmatprep.subr.bf16.mxu0 %v1627_v19  ;;  %2862 = vmatprep.subr.bf16.mxu1 %v1627_v19  ;;  %v1621_v23 = vld [vmem:[%s4165_s18 + $0x18] sm:$0xff]  ;;  %v1622_v26 = vld [vmem:[%s4165_s18 + $0x20] sm:$0xff]  ;;  %v1623_v28 = vld [vmem:[%s4165_s18 + $0x28] sm:$0xff] }
 0x366   : > { %v1632_v29 = vld [vmem:[%s4165_s18 + $0x70] sm:$0xff]  ;;  %v1633_v31 = vld [vmem:[%s4165_s18 + $0x78] sm:$0xff]  ;;  %v3183_v54 = vld [vmem:[%s3956_s7 + $0xe4] ss:$8 sps:$4 sm:$0xff]  }
 0x367   : > { %v1624_v30 = vld [vmem:[%s4165_s18 + $0x30] sm:$0xff]  ;;  %v1625_v32 = vld [vmem:[%s4165_s18 + $0x38] sm:$0xff]  ;;  %v3185_v55 = vld [vmem:[%s3956_s7 + $0x60] ss:$8 sps:$4 sm:$0xff]  }
 0x368   : > { %2672 = vmatpush3.bf16.msra.mxu0 %v1619_v20  ;;  %2870 = vmatpush3.bf16.msra.mxu1 %v1619_v20  ;;  %v3186_v56 = vld [vmem:[%s3956_s7 + $0xe0] ss:$8 sps:$4 sm:$0xff]   ;;  %v3187_v57 = vld [vmem:[%s3956_s7 + $0x74] ss:$8 sps:$4 sm:$0xff]   ;;  %v3191_v59 = vld [vmem:[%s3956_s7 + $0x70] ss:$8 sps:$4 sm:$0xff]  }
 0x369   : > { %2673 = vmatprep.subr.bf16.mxu0 %v1628_v21  ;;  %2863 = vmatprep.subr.bf16.mxu1 %v1628_v21  ;;  %v3189_v58 = vld [vmem:[%s3956_s7 + $0xf4] ss:$8 sps:$4 sm:$0xff]   ;;  %v3192_v60 = vld [vmem:[%s3956_s7 + $0xf0] ss:$8 sps:$4 sm:$0xff]   ;;  %v1566_v1 = vld [vmem:[%s3976_s22 + $0x80] sm:$0xff] }
 0x36a   : > { %v1551_v7 = vld [vmem:[%s3976_s22 + $0x8] sm:$0xff]  ;;  %v1552_v21 = vld [vmem:[%s3976_s22 + $0x10] sm:$0xff] }
 0x36b   : > { %v1567_v9 = vld [vmem:[%s3976_s22 + $0x88] sm:$0xff] }
 0x36c   : > { %2674 = vmatpush3.bf16.msra.mxu0 %v1620_v22  ;;  %2871 = vmatpush3.bf16.msra.mxu1 %v1620_v22 }
 0x36d   : > { %2675 = vmatprep.subr.bf16.mxu0 %v1629_v24  ;;  %2864 = vmatprep.subr.bf16.mxu1 %v1629_v24  ;;  %v1568_v24 = vld [vmem:[%s3976_s22 + $0x90] sm:$0xff] }
 0x370   : > { %2676 = vmatpush3.bf16.msra.mxu0 %v1621_v23  ;;  %2872 = vmatpush3.bf16.msra.mxu1 %v1621_v23 }
 0x371   : > { %2677 = vmatprep.subr.bf16.mxu0 %v1630_v25  ;;  %2865 = vmatprep.subr.bf16.mxu1 %v1630_v25 }
 0x374   : > { %2678 = vmatpush3.bf16.msra.mxu0 %v1622_v26  ;;  %2873 = vmatpush3.bf16.msra.mxu1 %v1622_v26 }
 0x375   : > { %2679 = vmatprep.subr.bf16.mxu0 %v1631_v27  ;;  %2866 = vmatprep.subr.bf16.mxu1 %v1631_v27 }
 0x378   : > { %2680 = vmatpush3.bf16.msra.mxu0 %v1623_v28  ;;  %2874 = vmatpush3.bf16.msra.mxu1 %v1623_v28 }
 0x379   : > { %2681 = vmatprep.subr.bf16.mxu0 %v1632_v29  ;;  %2867 = vmatprep.subr.bf16.mxu1 %v1632_v29  ;;  %v1553_v29 = vld [vmem:[%s3976_s22 + $0x18] sm:$0xff] }
 0x37c   : > { %2682 = vmatpush3.bf16.msra.mxu0 %v1624_v30  ;;  %2875 = vmatpush3.bf16.msra.mxu1 %v1624_v30 }
 0x37d   : > { %2683 = vmatprep.subr.bf16.mxu0 %v1633_v31  ;;  %2868 = vmatprep.subr.bf16.mxu1 %v1633_v31  ;;  %v1569_v31 = vld [vmem:[%s3976_s22 + $0x98] sm:$0xff] }
 0x380   : > { %2684 = vmatpush3.bf16.msra.mxu0 %v1625_v32  ;;  %2876 = vmatpush3.bf16.msra.mxu1 %v1625_v32 }
 0x383   : > { %1827 = vmatmul.mubr.bf16.vlgmr.msra.gmra.mrb[0].mxu0 %v3145_v33  ;;  %1891 = vmatmul.mubr.bf16.vlgmr.msra.gmra.mrb[0].mxu1 %v3148_v34 }
 0x384   : > { %1834 = vmatprep.mubr.bf16.mxu0 %v3151_v35  ;;  %1898 = vmatprep.mubr.bf16.mxu1 %v3153_v37 }
 0x38b   : > { %1835 = vmatmul.mubr.bf16.gmra.mrb[4].mxu0 %v3155_v38  ;;  %1899 = vmatmul.mubr.bf16.gmra.mrb[4].mxu1 %v3156_v39 }
 0x38c   : > { %1842 = vmatprep.mubr.bf16.mxu0 %v3157_v40  ;;  %1906 = vmatprep.mubr.bf16.mxu1 %v3159_v42 }
 0x393   : > { %1843 = vmatmul.mubr.bf16.gmra.mrb[8].mxu0 %v3161_v43  ;;  %1907 = vmatmul.mubr.bf16.gmra.mrb[8].mxu1 %v3162_v44  ;;  %v1554_v43 = vld [vmem:[%s3976_s22 + $0x20] sm:$0xff] }
 0x394   : > { %1850 = vmatprep.mubr.bf16.mxu0 %v3163_v10  ;;  %1914 = vmatprep.mubr.bf16.mxu1 %v3165_v15  ;;  %v1570_v10 = vld [vmem:[%s3976_s22 + $0xa0] sm:$0xff] }
 0x39b   : > { %1851 = vmatmul.mubr.bf16.gmra.mrb[12].mxu0 %v3167_v36  ;;  %1915 = vmatmul.mubr.bf16.gmra.mrb[12].mxu1 %v3168_v41 }
 0x39c   : > { %1858 = vmatprep.mubr.bf16.mxu0 %v3169_v46  ;;  %1922 = vmatprep.mubr.bf16.mxu1 %v3171_v47 }
 0x3a3   : > { %1859 = vmatmul.mubr.bf16.gmra.mrb[16].mxu0 %v3173_v48  ;;  %1923 = vmatmul.mubr.bf16.gmra.mrb[16].mxu1 %v3174_v49  ;;  %v1555_v48 = vld [vmem:[%s3976_s22 + $0x28] sm:$0xff] }
 0x3a4   : > { %1866 = vmatprep.mubr.bf16.mxu0 %v3175_v45  ;;  %1930 = vmatprep.mubr.bf16.mxu1 %v3177_v50  ;;  %v1571_v45 = vld [vmem:[%s3976_s22 + $0xa8] sm:$0xff] }
 0x3ab   : > { %1867 = vmatmul.mubr.bf16.gmra.mrb[20].mxu0 %v3179_v51  ;;  %1931 = vmatmul.mubr.bf16.gmra.mrb[20].mxu1 %v3180_v52 }
 0x3ac   : > { %1874 = vmatprep.mubr.bf16.mxu0 %v3181_v53  ;;  %1938 = vmatprep.mubr.bf16.mxu1 %v3183_v54 }
 0x3b3   : > { %1875 = vmatmul.mubr.bf16.gmra.mrb[24].mxu0 %v3185_v55  ;;  %1939 = vmatmul.mubr.bf16.gmra.mrb[24].mxu1 %v3186_v56 }
 0x3b4   : > { %1882 = vmatprep.mubr.bf16.mxu0 %v3187_v57  ;;  %1946 = vmatprep.mubr.bf16.mxu1 %v3189_v58 }
 0x3bb   : > { %1883 = vmatmul.mubr.bf16.gmra.mrb[28].mxu0 %v3191_v59  ;;  %1947 = vmatmul.mubr.bf16.gmra.mrb[28].mxu1 %v3192_v60  ;;  %v1556_v59 = vld [vmem:[%s3976_s22 + $0x30] sm:$0xff] }
 0x456   : > { %v2685_v61 = vpop.f32.mrb[0].mxu0  ;;  %v2733_v62 = vpop.f32.mrb[0].mxu1 }
 0x457   : > { %v2686_v0 = vpop.f32.mrb[1].mxu0  ;;  %v2734_v2 = vpop.f32.mrb[1].mxu1 }
 0x458   : > { %v2687_v3 = vadd.f32 %v2686_v0, %v2685_v61  ;;  %v2735_v4 = vadd.f32 %v2734_v2, %v2733_v62  ;;  %v2688_v5 = vpop.f32.mrb[2].mxu0  ;;  %v2736_v6 = vpop.f32.mrb[2].mxu1  ;;  %v1572_v61 = vld [vmem:[%s3976_s22 + $0xb0] sm:$0xff] }
 0x459   : > { %v2689_v8 = vpop.f32.mrb[3].mxu0  ;;  %v2737_v11 = vpop.f32.mrb[3].mxu1 }
 0x45a   : > { %v1955_v12 = vadd.f32 %v2687_v3, %v1550_v63  ;;  %v1971_v13 = vadd.f32 %v2735_v4, %v1566_v1  ;;  %v2690_v14 = vadd.f32 %v2689_v8, %v2688_v5  ;;  %v2738_v16 = vadd.f32 %v2737_v11, %v2736_v6  ;;  %v1557_v3 = vld [vmem:[%s3976_s22 + $0x38] sm:$0xff] }
 0x45b   : > { %v1573_v5 = vld [vmem:[%s3976_s22 + $0xb8] sm:$0xff] }
 0x45c   : > { %1987 = vst [vmem:[%s3976_s22] sm:$0xff] %v1955_v12  ;;  %2003 = vst [vmem:[%s3976_s22 + $0x80] sm:$0xff] %v1971_v13  ;;  %v1956_v17 = vadd.f32 %v2690_v14, %v1551_v7  ;;  %v1972_v18 = vadd.f32 %v2738_v16, %v1567_v9 }
 0x45e   : > { %1988 = vst [vmem:[%s3976_s22 + $0x8] sm:$0xff] %v1956_v17  ;;  %2004 = vst [vmem:[%s3976_s22 + $0x88] sm:$0xff] %v1972_v18  ;;  %v2691_v19 = vpop.f32.mrb[4].mxu0  ;;  %v2739_v20 = vpop.f32.mrb[4].mxu1  ;;  %v1558_v17 = vld [vmem:[%s3976_s22 + $0x40] sm:$0xff] }
 0x45f   : > { %v2692_v22 = vpop.f32.mrb[5].mxu0  ;;  %v2740_v23 = vpop.f32.mrb[5].mxu1 }
 0x460   : > { %v2693_v25 = vadd.f32 %v2692_v22, %v2691_v19  ;;  %v2741_v26 = vadd.f32 %v2740_v23, %v2739_v20  ;;  %v2694_v27 = vpop.f32.mrb[6].mxu0  ;;  %v2742_v28 = vpop.f32.mrb[6].mxu1  ;;  %v1574_v19 = vld [vmem:[%s3976_s22 + $0xc0] sm:$0xff] }
 0x461   : > { %v2695_v30 = vpop.f32.mrb[7].mxu0  ;;  %v2743_v32 = vpop.f32.mrb[7].mxu1 }
 0x462   : > { %v1957_v33 = vadd.f32 %v2693_v25, %v1552_v21  ;;  %v1973_v34 = vadd.f32 %v2741_v26, %v1568_v24  ;;  %v2696_v35 = vadd.f32 %v2695_v30, %v2694_v27  ;;  %v2744_v37 = vadd.f32 %v2743_v32, %v2742_v28  ;;  %v1559_v25 = vld [vmem:[%s3976_s22 + $0x48] sm:$0xff] }
 0x463   : > { %v1575_v27 = vld [vmem:[%s3976_s22 + $0xc8] sm:$0xff] }
 0x464   : > { %1989 = vst [vmem:[%s3976_s22 + $0x10] sm:$0xff] %v1957_v33  ;;  %2005 = vst [vmem:[%s3976_s22 + $0x90] sm:$0xff] %v1973_v34  ;;  %v1958_v38 = vadd.f32 %v2696_v35, %v1553_v29  ;;  %v1974_v39 = vadd.f32 %v2744_v37, %v1569_v31 }
 0x466   : > { %1990 = vst [vmem:[%s3976_s22 + $0x18] sm:$0xff] %v1958_v38  ;;  %2006 = vst [vmem:[%s3976_s22 + $0x98] sm:$0xff] %v1974_v39  ;;  %v2697_v40 = vpop.f32.mrb[8].mxu0  ;;  %v2745_v42 = vpop.f32.mrb[8].mxu1  ;;  %v1560_v38 = vld [vmem:[%s3976_s22 + $0x50] sm:$0xff] }
 0x467   : > { %v2698_v44 = vpop.f32.mrb[9].mxu0  ;;  %v2746_v15 = vpop.f32.mrb[9].mxu1 }
 0x468   : > { %v2699_v36 = vadd.f32 %v2698_v44, %v2697_v40  ;;  %v2747_v41 = vadd.f32 %v2746_v15, %v2745_v42  ;;  %v2700_v46 = vpop.f32.mrb[10].mxu0  ;;  %v2748_v47 = vpop.f32.mrb[10].mxu1  ;;  %v1576_v40 = vld [vmem:[%s3976_s22 + $0xd0] sm:$0xff] }
 0x469   : > { %v2701_v49 = vpop.f32.mrb[11].mxu0  ;;  %v2749_v50 = vpop.f32.mrb[11].mxu1 }
 0x46a   : > { %v1959_v51 = vadd.f32 %v2699_v36, %v1554_v43  ;;  %v1975_v52 = vadd.f32 %v2747_v41, %v1570_v10  ;;  %v2702_v53 = vadd.f32 %v2701_v49, %v2700_v46  ;;  %v2750_v54 = vadd.f32 %v2749_v50, %v2748_v47  ;;  %v1561_v36 = vld [vmem:[%s3976_s22 + $0x58] sm:$0xff] }
 0x46b   : > { %v1577_v46 = vld [vmem:[%s3976_s22 + $0xd8] sm:$0xff] }
 0x46c   : > { %1991 = vst [vmem:[%s3976_s22 + $0x20] sm:$0xff] %v1959_v51  ;;  %2007 = vst [vmem:[%s3976_s22 + $0xa0] sm:$0xff] %v1975_v52  ;;  %v1960_v55 = vadd.f32 %v2702_v53, %v1555_v48  ;;  %v1976_v56 = vadd.f32 %v2750_v54, %v1571_v45 }
 0x46e   : > { %1992 = vst [vmem:[%s3976_s22 + $0x28] sm:$0xff] %v1960_v55  ;;  %2008 = vst [vmem:[%s3976_s22 + $0xa8] sm:$0xff] %v1976_v56  ;;  %v2703_v57 = vpop.f32.mrb[12].mxu0  ;;  %v2751_v58 = vpop.f32.mrb[12].mxu1  ;;  %v1562_v55 = vld [vmem:[%s3976_s22 + $0x60] sm:$0xff] }
 0x46f   : > { %v2704_v60 = vpop.f32.mrb[13].mxu0  ;;  %v2752_v62 = vpop.f32.mrb[13].mxu1 }
 0x470   : > { %v2705_v63 = vadd.f32 %v2704_v60, %v2703_v57  ;;  %v2753_v0 = vadd.f32 %v2752_v62, %v2751_v58  ;;  %v2706_v1 = vpop.f32.mrb[14].mxu0  ;;  %v2754_v2 = vpop.f32.mrb[14].mxu1  ;;  %v1578_v57 = vld [vmem:[%s3976_s22 + $0xe0] sm:$0xff] }
 0x471   : > { %v2707_v4 = vpop.f32.mrb[15].mxu0  ;;  %v2755_v6 = vpop.f32.mrb[15].mxu1 }
 0x472   : > { %v1961_v7 = vadd.f32 %v2705_v63, %v1556_v59  ;;  %v1977_v8 = vadd.f32 %v2753_v0, %v1572_v61  ;;  %v2708_v9 = vadd.f32 %v2707_v4, %v2706_v1  ;;  %v2756_v11 = vadd.f32 %v2755_v6, %v2754_v2  ;;  %v1563_v63 = vld [vmem:[%s3976_s22 + $0x68] sm:$0xff] }
 0x473   : > { %v1579_v1 = vld [vmem:[%s3976_s22 + $0xe8] sm:$0xff] }
 0x474   : > { %1993 = vst [vmem:[%s3976_s22 + $0x30] sm:$0xff] %v1961_v7  ;;  %2009 = vst [vmem:[%s3976_s22 + $0xb0] sm:$0xff] %v1977_v8  ;;  %v1962_v12 = vadd.f32 %v2708_v9, %v1557_v3  ;;  %v1978_v13 = vadd.f32 %v2756_v11, %v1573_v5 }
 0x476   : > { %1994 = vst [vmem:[%s3976_s22 + $0x38] sm:$0xff] %v1962_v12  ;;  %2010 = vst [vmem:[%s3976_s22 + $0xb8] sm:$0xff] %v1978_v13  ;;  %v2709_v14 = vpop.f32.mrb[16].mxu0  ;;  %v2757_v16 = vpop.f32.mrb[16].mxu1  ;;  %v1564_v12 = vld [vmem:[%s3976_s22 + $0x70] sm:$0xff] }
 0x477   : > { %v2710_v18 = vpop.f32.mrb[17].mxu0  ;;  %v2758_v20 = vpop.f32.mrb[17].mxu1 }
 0x478   : > { %v2711_v21 = vadd.f32 %v2710_v18, %v2709_v14  ;;  %v2759_v22 = vadd.f32 %v2758_v20, %v2757_v16  ;;  %v2712_v24 = vpop.f32.mrb[18].mxu0  ;;  %v2760_v23 = vpop.f32.mrb[18].mxu1  ;;  %v1580_v14 = vld [vmem:[%s3976_s22 + $0xf0] sm:$0xff] }
 0x479   : > { %v2713_v26 = vpop.f32.mrb[19].mxu0  ;;  %v2761_v28 = vpop.f32.mrb[19].mxu1 }
 0x47a   : > { %v1963_v29 = vadd.f32 %v2711_v21, %v1558_v17  ;;  %v1979_v30 = vadd.f32 %v2759_v22, %v1574_v19  ;;  %v2714_v31 = vadd.f32 %v2713_v26, %v2712_v24  ;;  %v2762_v32 = vadd.f32 %v2761_v28, %v2760_v23  ;;  %v1565_v21 = vld [vmem:[%s3976_s22 + $0x78] sm:$0xff] }
 0x47b   : > { %v1581_v24 = vld [vmem:[%s3976_s22 + $0xf8] sm:$0xff] }
 0x47c   : > { %1995 = vst [vmem:[%s3976_s22 + $0x40] sm:$0xff] %v1963_v29  ;;  %2011 = vst [vmem:[%s3976_s22 + $0xc0] sm:$0xff] %v1979_v30  ;;  %v1964_v33 = vadd.f32 %v2714_v31, %v1559_v25  ;;  %v1980_v34 = vadd.f32 %v2762_v32, %v1575_v27  ;;  %v2023_v31 = vld [vmem:[%s3976_s22] sm:$0xff] (!%p2443_p8) }
 0x47d   : > { %v4282_v32 = vld [vmem:[%s4597_s4] ss:$0 sm:$0xff] (!%p2443_p8) }
 0x47e   : > { %1996 = vst [vmem:[%s3976_s22 + $0x48] sm:$0xff] %v1964_v33  ;;  %2012 = vst [vmem:[%s3976_s22 + $0xc8] sm:$0xff] %v1980_v34  ;;  %v2715_v35 = vpop.f32.mrb[20].mxu0  ;;  %v2763_v37 = vpop.f32.mrb[20].mxu1  ;;  %v2024_v33 = vld [vmem:[%s3976_s22 + $0x8] sm:$0xff] (!%p2443_p8)  ;;  %v2062_v34 = vadd.f32 (!%p2443_p8), %v4282_v32, %v2023_v31 }
 0x47f   : > { %v2716_v39 = vpop.f32.mrb[21].mxu0  ;;  %v2764_v42 = vpop.f32.mrb[21].mxu1 }
 0x480   : > { %v2717_v43 = vadd.f32 %v2716_v39, %v2715_v35  ;;  %v2765_v44 = vadd.f32 %v2764_v42, %v2763_v37  ;;  %v2718_v10 = vpop.f32.mrb[22].mxu0  ;;  %v2766_v15 = vpop.f32.mrb[22].mxu1  ;;  %v2063_v35 = vadd.f32 (!%p2443_p8), %v4282_v32, %v2024_v33  ;;  %v2025_v37 = vld [vmem:[%s3976_s22 + $0x10] sm:$0xff] (!%p2443_p8)  ;;  %v2027_v39 = vld [vmem:[%s3976_s22 + $0x20] sm:$0xff] (!%p2443_p8) }
 0x481   : > { %v2719_v41 = vpop.f32.mrb[23].mxu0  ;;  %v2767_v47 = vpop.f32.mrb[23].mxu1 }
 0x482   : > { %v1965_v48 = vadd.f32 %v2717_v43, %v1560_v38  ;;  %v1981_v49 = vadd.f32 %v2765_v44, %v1576_v40  ;;  %v2720_v45 = vadd.f32 %v2719_v41, %v2718_v10  ;;  %v2768_v50 = vadd.f32 %v2767_v47, %v2766_v15  ;;  %v2026_v38 = vld [vmem:[%s3976_s22 + $0x18] sm:$0xff] (!%p2443_p8)  ;;  %v2028_v44 = vld [vmem:[%s3976_s22 + $0x28] sm:$0xff] (!%p2443_p8)  ;;  %v2029_v10 = vld [vmem:[%s3976_s22 + $0x30] sm:$0xff] (!%p2443_p8) }
 0x483   : > { %v2064_v40 = vadd.f32 (!%p2443_p8), %v4282_v32, %v2025_v37  ;;  %v2065_v42 = vadd.f32 (!%p2443_p8), %v4282_v32, %v2026_v38  ;;  %v2066_v43 = vadd.f32 (!%p2443_p8), %v4282_v32, %v2027_v39  ;;  %v2030_v15 = vld [vmem:[%s3976_s22 + $0x38] sm:$0xff] (!%p2443_p8)  ;;  %v2095_v41 = vmax.f32 (!%p2443_p8), %v2063_v35, 0.0 }
 0x484   : > { %1997 = vst [vmem:[%s3976_s22 + $0x50] sm:$0xff] %v1965_v48  ;;  %2013 = vst [vmem:[%s3976_s22 + $0xd0] sm:$0xff] %v1981_v49  ;;  %v1966_v51 = vadd.f32 %v2720_v45, %v1561_v36  ;;  %v1982_v52 = vadd.f32 %v2768_v50, %v1577_v46  ;;  %v2094_v36 = vmax.f32 (!%p2443_p8), %v2062_v34, 0.0  ;;  %v2067_v46 = vadd.f32 (!%p2443_p8), %v4282_v32, %v2028_v44  ;;  %v2031_v48 = vld [vmem:[%s3976_s22 + $0x40] sm:$0xff] (!%p2443_p8) }
 0x485   : > { %v2068_v47 = vadd.f32 (!%p2443_p8), %v4282_v32, %v2029_v10  ;;  %v2032_v49 = vld [vmem:[%s3976_s22 + $0x48] sm:$0xff] (!%p2443_p8)  ;;  %v2096_v50 = vmax.f32 (!%p2443_p8), %v2064_v40, 0.0  ;;  %2127 = vst [vmem:[%s3976_s22 + $0x8] sm:$0xff] (!%p2443_p8), %v2095_v41 }
 0x486   : > { %1998 = vst [vmem:[%s3976_s22 + $0x58] sm:$0xff] %v1966_v51  ;;  %2014 = vst [vmem:[%s3976_s22 + $0xd8] sm:$0xff] %v1982_v52  ;;  %v2721_v53 = vpop.f32.mrb[24].mxu0  ;;  %v2769_v54 = vpop.f32.mrb[24].mxu1  ;;  %v2097_v51 = vmax.f32 (!%p2443_p8), %v2065_v42, 0.0  ;;  %v2098_v52 = vmax.f32 (!%p2443_p8), %v2066_v43, 0.0 }
 0x487   : > { %v2722_v56 = vpop.f32.mrb[25].mxu0  ;;  %v2770_v58 = vpop.f32.mrb[25].mxu1  ;;  %2126 = vst [vmem:[%s3976_s22] sm:$0xff] (!%p2443_p8), %v2094_v36  ;;  %2128 = vst [vmem:[%s3976_s22 + $0x10] sm:$0xff] (!%p2443_p8), %v2096_v50 }
 0x488   : > { %v2723_v59 = vadd.f32 %v2722_v56, %v2721_v53  ;;  %v2771_v60 = vadd.f32 %v2770_v58, %v2769_v54  ;;  %v2724_v61 = vpop.f32.mrb[26].mxu0  ;;  %v2772_v62 = vpop.f32.mrb[26].mxu1  ;;  %v2069_v53 = vadd.f32 (!%p2443_p8), %v4282_v32, %v2030_v15  ;;  %v2100_v58 = vmax.f32 (!%p2443_p8), %v2068_v47, 0.0  ;;  %2129 = vst [vmem:[%s3976_s22 + $0x18] sm:$0xff] (!%p2443_p8), %v2097_v51  ;;  %2130 = vst [vmem:[%s3976_s22 + $0x20] sm:$0xff] (!%p2443_p8), %v2098_v52 }
 0x489   : > { %v2725_v0 = vpop.f32.mrb[27].mxu0  ;;  %v2773_v2 = vpop.f32.mrb[27].mxu1 }
 0x48a   : > { %v1967_v3 = vadd.f32 %v2723_v59, %v1562_v55  ;;  %v1983_v4 = vadd.f32 %v2771_v60, %v1578_v57  ;;  %v2726_v5 = vadd.f32 %v2725_v0, %v2724_v61  ;;  %v2774_v6 = vadd.f32 %v2773_v2, %v2772_v62  ;;  %2132 = vst [vmem:[%s3976_s22 + $0x30] sm:$0xff] (!%p2443_p8), %v2100_v58 }
 0x48b   : > { %v2033_v45 = vld [vmem:[%s3976_s22 + $0x50] sm:$0xff] (!%p2443_p8)  ;;  %v2099_v57 = vmax.f32 (!%p2443_p8), %v2067_v46, 0.0  ;;  %v2070_v59 = vadd.f32 (!%p2443_p8), %v4282_v32, %v2031_v48  ;;  %v2071_v60 = vadd.f32 (!%p2443_p8), %v4282_v32, %v2032_v49 }
 0x48c   : > { %1999 = vst [vmem:[%s3976_s22 + $0x60] sm:$0xff] %v1967_v3  ;;  %2015 = vst [vmem:[%s3976_s22 + $0xe0] sm:$0xff] %v1983_v4  ;;  %v1968_v7 = vadd.f32 %v2726_v5, %v1563_v63  ;;  %v1984_v8 = vadd.f32 %v2774_v6, %v1579_v1  ;;  %v2101_v63 = vmax.f32 (!%p2443_p8), %v2069_v53, 0.0  ;;  %v2072_v0 = vadd.f32 (!%p2443_p8), %v4282_v32, %v2033_v45  ;;  %v2039_v3 = vld [vmem:[%s3976_s22 + $0x80] sm:$0xff] (!%p2443_p8)  ;;  %v2040_v4 = vld [vmem:[%s3976_s22 + $0x88] sm:$0xff] (!%p2443_p8) }
 0x48d   : > { %v2034_v54 = vld [vmem:[%s3976_s22 + $0x58] sm:$0xff] (!%p2443_p8)  ;;  %2131 = vst [vmem:[%s3976_s22 + $0x28] sm:$0xff] (!%p2443_p8), %v2099_v57  ;;  %v2102_v5 = vmax.f32 (!%p2443_p8), %v2070_v59, 0.0  ;;  %v2103_v6 = vmax.f32 (!%p2443_p8), %v2071_v60, 0.0  ;;  %v2049_v37 = vld [vmem:[%s3976_s22 + $0xd0] sm:$0xff] (!%p2443_p8) }
 0x48e   : > { %2000 = vst [vmem:[%s3976_s22 + $0x68] sm:$0xff] %v1968_v7  ;;  %2016 = vst [vmem:[%s3976_s22 + $0xe8] sm:$0xff] %v1984_v8  ;;  %v2727_v9 = vpop.f32.mrb[28].mxu0  ;;  %v2775_v11 = vpop.f32.mrb[28].mxu1  ;;  %v2073_v1 = vadd.f32 (!%p2443_p8), %v4282_v32, %v2034_v54  ;;  %v2050_v38 = vld [vmem:[%s3976_s22 + $0xd8] sm:$0xff] (!%p2443_p8)  ;;  %v2088_v45 = vadd.f32 (!%p2443_p8), %v4282_v32, %v2049_v37 }
 0x48f   : > { %v2728_v13 = vpop.f32.mrb[29].mxu0  ;;  %v2776_v16 = vpop.f32.mrb[29].mxu1  ;;  %2133 = vst [vmem:[%s3976_s22 + $0x38] sm:$0xff] (!%p2443_p8), %v2101_v63  ;;  %2134 = vst [vmem:[%s3976_s22 + $0x40] sm:$0xff] (!%p2443_p8), %v2102_v5  ;;  %v2089_v50 = vadd.f32 (!%p2443_p8), %v4282_v32, %v2050_v38 }
 0x490   : > { %v2729_v17 = vadd.f32 %v2728_v13, %v2727_v9  ;;  %v2777_v18 = vadd.f32 %v2776_v16, %v2775_v11  ;;  %v2730_v19 = vpop.f32.mrb[30].mxu0  ;;  %v2778_v20 = vpop.f32.mrb[30].mxu1  ;;  %2022 = sbr.rel (%p2443_p8) target bundleno = 1188 (0x4a4), region = 84  ;;  %v2041_v9 = vld [vmem:[%s3976_s22 + $0x90] sm:$0xff] (!%p2443_p8)  ;;  %v2042_v11 = vld [vmem:[%s3976_s22 + $0x98] sm:$0xff] (!%p2443_p8)  ;;  %v2104_v13 = vmax.f32 (!%p2443_p8), %v2072_v0, 0.0 }
 0x491   : > { %v2731_v22 = vpop.f32.mrb[31].mxu0  ;;  %v2779_v23 = vpop.f32.mrb[31].mxu1  ;;  %2135 = vst [vmem:[%s3976_s22 + $0x48] sm:$0xff] (!%p2443_p8), %v2103_v6  ;;  %v2121_v57 = vmax.f32 (!%p2443_p8), %v2089_v50, 0.0 }
 0x492   : > { %v1969_v25 = vadd.f32 %v2729_v17, %v1564_v12  ;;  %v1985_v26 = vadd.f32 %v2777_v18, %v1580_v14  ;;  %v2732_v27 = vadd.f32 %v2731_v22, %v2730_v19  ;;  %v2780_v28 = vadd.f32 %v2779_v23, %v2778_v20  ;;  %v2043_v12 = vld [vmem:[%s3976_s22 + $0xa0] sm:$0xff] (!%p2443_p8)  ;;  %v2044_v18 = vld [vmem:[%s3976_s22 + $0xa8] sm:$0xff] (!%p2443_p8)  ;;  %v2045_v19 = vld [vmem:[%s3976_s22 + $0xb0] sm:$0xff] (!%p2443_p8)  ;;  %2136 = vst [vmem:[%s3976_s22 + $0x50] sm:$0xff] (!%p2443_p8), %v2104_v13 }
 0x493   : > { %v2035_v55 = vld [vmem:[%s3976_s22 + $0x60] sm:$0xff] (!%p2443_p8)  ;;  %v2105_v14 = vmax.f32 (!%p2443_p8), %v2073_v1, 0.0  ;;  %v2078_v22 = vadd.f32 (!%p2443_p8), %v4282_v32, %v2039_v3  ;;  %v2046_v23 = vld [vmem:[%s3976_s22 + $0xb8] sm:$0xff] (!%p2443_p8)  ;;  %v2083_v34 = vadd.f32 (!%p2443_p8), %v4282_v32, %v2044_v18  ;;  %v2084_v35 = vadd.f32 (!%p2443_p8), %v4282_v32, %v2045_v19  ;;  %2153 = vst [vmem:[%s3976_s22 + $0xd8] sm:$0xff] (!%p2443_p8), %v2121_v57 }
 0x494   : > { %2001 = vst [vmem:[%s3976_s22 + $0x70] sm:$0xff] %v1969_v25  ;;  %2017 = vst [vmem:[%s3976_s22 + $0xf0] sm:$0xff] %v1985_v26  ;;  %v1970_v29 = vadd.f32 %v2732_v27, %v1565_v21  ;;  %v1986_v30 = vadd.f32 %v2780_v28, %v1581_v24  ;;  %v2074_v2 = vadd.f32 (!%p2443_p8), %v4282_v32, %v2035_v55  ;;  %v2051_v39 = vld [vmem:[%s3976_s22 + $0xe0] sm:$0xff] (!%p2443_p8) }
 0x495   : > { %v2036_v56 = vld [vmem:[%s3976_s22 + $0x68] sm:$0xff] (!%p2443_p8)  ;;  %v2079_v24 = vadd.f32 (!%p2443_p8), %v4282_v32, %v2040_v4  ;;  %2137 = vst [vmem:[%s3976_s22 + $0x58] sm:$0xff] (!%p2443_p8), %v2105_v14  ;;  %v2080_v26 = vadd.f32 (!%p2443_p8), %v4282_v32, %v2041_v9  ;;  %v2081_v27 = vadd.f32 (!%p2443_p8), %v4282_v32, %v2042_v11  ;;  %v2082_v28 = vadd.f32 (!%p2443_p8), %v4282_v32, %v2043_v12 }
 0x496   : > { %2002 = vst [vmem:[%s3976_s22 + $0x78] sm:$0xff] %v1970_v29  ;;  %2018 = vst [vmem:[%s3976_s22 + $0xf8] sm:$0xff] %v1986_v30  ;;  %v2075_v7 = vadd.f32 (!%p2443_p8), %v4282_v32, %v2036_v56  ;;  %v2106_v16 = vmax.f32 (!%p2443_p8), %v2074_v2, 0.0  ;;  %v2047_v29 = vld [vmem:[%s3976_s22 + $0xc0] sm:$0xff] (!%p2443_p8)  ;;  %v2048_v30 = vld [vmem:[%s3976_s22 + $0xc8] sm:$0xff] (!%p2443_p8)  ;;  %v2110_v31 = vmax.f32 (!%p2443_p8), %v2078_v22, 0.0  ;;  %v2085_v44 = vadd.f32 (!%p2443_p8), %v4282_v32, %v2046_v23 }
 0x497   : > { %v2111_v33 = vmax.f32 %v2079_v24, 0.0  ;;  %v2112_v40 = vmax.f32 %v2080_v26, 0.0  ;;  %v2113_v42 = vmax.f32 %v2081_v27, 0.0  ;;  %v2114_v43 = vmax.f32 %v2082_v28, 0.0  ;;  %v2052_v10 = vld [vmem:[%s3976_s22 + $0xe8] sm:$0xff] }
 0x498   : > { %v2107_v20 = vmax.f32 %v2075_v7, 0.0  ;;  %2138 = vst [vmem:[%s3976_s22 + $0x60] sm:$0xff] %v2106_v16  ;;  %2142 = vst [vmem:[%s3976_s22 + $0x80] sm:$0xff] %v2110_v31  ;;  %v2115_v36 = vmax.f32 %v2083_v34, 0.0  ;;  %v2116_v41 = vmax.f32 %v2084_v35, 0.0  ;;  %v2086_v46 = vadd.f32 %v4282_v32, %v2047_v29 }
 0x499   : > { %2143 = vst [vmem:[%s3976_s22 + $0x88] sm:$0xff] %v2111_v33  ;;  %v2087_v47 = vadd.f32 %v4282_v32, %v2048_v30  ;;  %2144 = vst [vmem:[%s3976_s22 + $0x90] sm:$0xff] %v2112_v40  ;;  %v2117_v49 = vmax.f32 %v2085_v44, 0.0  ;;  %v2090_v51 = vadd.f32 %v4282_v32, %v2051_v39  ;;  %v2091_v54 = vadd.f32 %v4282_v32, %v2052_v10 }
 0x49a   : > { %2139 = vst [vmem:[%s3976_s22 + $0x68] sm:$0xff] %v2107_v20  ;;  %2145 = vst [vmem:[%s3976_s22 + $0x98] sm:$0xff] %v2113_v42  ;;  %v2118_v52 = vmax.f32 %v2086_v46, 0.0  ;;  %v2120_v56 = vmax.f32 %v2088_v45, 0.0 }
 0x49b   : > { %v2037_v61 = vld [vmem:[%s3976_s22 + $0x70] sm:$0xff]  ;;  %2146 = vst [vmem:[%s3976_s22 + $0xa0] sm:$0xff] %v2114_v43  ;;  %2147 = vst [vmem:[%s3976_s22 + $0xa8] sm:$0xff] %v2115_v36  ;;  %v2119_v53 = vmax.f32 %v2087_v47, 0.0  ;;  %v2122_v58 = vmax.f32 %v2090_v51, 0.0  ;;  %v2123_v60 = vmax.f32 %v2091_v54, 0.0 }
 0x49c   : > { %v2076_v8 = vadd.f32 %v4282_v32, %v2037_v61  ;;  %v2053_v15 = vld [vmem:[%s3976_s22 + $0xf0] sm:$0xff]  ;;  %2148 = vst [vmem:[%s3976_s22 + $0xb0] sm:$0xff] %v2116_v41  ;;  %2149 = vst [vmem:[%s3976_s22 + $0xb8] sm:$0xff] %v2117_v49 }
 0x49d   : > { %v2038_v62 = vld [vmem:[%s3976_s22 + $0x78] sm:$0xff]  ;;  %v2092_v55 = vadd.f32 %v4282_v32, %v2053_v15  ;;  %2150 = vst [vmem:[%s3976_s22 + $0xc0] sm:$0xff] %v2118_v52  ;;  %2151 = vst [vmem:[%s3976_s22 + $0xc8] sm:$0xff] %v2119_v53 }
 0x49e   : > { %v2077_v17 = vadd.f32 %v4282_v32, %v2038_v62  ;;  %v2108_v21 = vmax.f32 %v2076_v8, 0.0  ;;  %v2054_v48 = vld [vmem:[%s3976_s22 + $0xf8] sm:$0xff]  ;;  %2152 = vst [vmem:[%s3976_s22 + $0xd0] sm:$0xff] %v2120_v56  ;;  %2154 = vst [vmem:[%s3976_s22 + $0xe0] sm:$0xff] %v2122_v58 }
 0x49f   : > { %v2093_v59 = vadd.f32 %v4282_v32, %v2054_v48  ;;  %v2124_v61 = vmax.f32 %v2092_v55, 0.0  ;;  %2155 = vst [vmem:[%s3976_s22 + $0xe8] sm:$0xff] %v2123_v60 }
 0x4a0   : > { %v2109_v25 = vmax.f32 %v2077_v17, 0.0  ;;  %2140 = vst [vmem:[%s3976_s22 + $0x70] sm:$0xff] %v2108_v21 }
 0x4a1   : > { %v2125_v62 = vmax.f32 %v2093_v59, 0.0  ;;  %2156 = vst [vmem:[%s3976_s22 + $0xf0] sm:$0xff] %v2124_v61 }
 0x4a2   : > { %2141 = vst [vmem:[%s3976_s22 + $0x78] sm:$0xff] %v2109_v25 }
 0x4a3   : > { %2157 = vst [vmem:[%s3976_s22 + $0xf8] sm:$0xff] %v2125_v62 }
 0x4a4 PF: > { %s4598_s17 = sld [smem:[#allocation24_spill]]  ;;  %s4599_s5 = sld [smem:[#allocation23_spill]] }
 0x4a5   : > { %s4601_s1 = sld [smem:[#allocation31_spill]]  ;;  %s2173_s28 = sshll.u32 %s3976_s22, 4  ;;  %s4382_s28 = int_to_ptr.vmem [resolvable:$true] %s2173_s28 }
 0x4a6   : > { %s4602_s27 = sld [smem:[#allocation42_spill]]  ;;  %s4391_s18 = scalar_lea.sflag [#allocation6], %s397_s3 }
 0x4a7   : > { %s3311_s7 = scalar_lea.vmem %s4382_s28, 4096  ;;  %s3522_s22 = smov [#allocation12]  }
 0x4a8   : > { %p3312_p12 = scmp.ne.s32.totalorder %s4382_s28, %s3311_s7  ;;  %s3315_s14 = sshll.u32 %s3522_s22, 4  ;;  %s3316_s14 = int_to_ptr.vmem [resolvable:$false] %s3315_s14 }
 0x4a9   : > { %s3317_s4 = scalar_lea.vmem %s3316_s14, 8192  ;;  %p3318_p11 = scmp.lt.s32.totalorder %s4382_s28, %s3316_s14 }
 0x4aa   : > { %s2166_s2 = smul.u32 %s4599_s5, %s4598_s17  ;;  %p3319_p0 = scmp.lt.s32.totalorder %s3317_s4, %s3311_s7 }
 0x4ab   : > { %p4604_p7 = scmp.ne.s32.totalorder %s4601_s1, 0 }
 0x4ac   : > { %s2453_s21 = sshll.u32 %s2166_s2, 12  ;;  %s4603_s19 = smov %s4602_s27 }
 0x4ad   : > { %s4387_s12 = scalar_lea.hbm %s4602_s27, %s2453_s21  ;;  %p3313_p3 = pnand %p3312_p12, %p4604_p7 }
 0x4ae   : > { %p3320_p1 = por %p3319_p0, %p3318_p11 }
 0x4af   : > { %p3314_p9 = pneg %p3313_p3 }
 0x4b1   : > { %p3321_p10 = pnand %p3320_p1, %p3314_p9 }
 0x4b3   : > { %3324 = shalt.err (!%p3321_p10)
}
 0x4b4   : > { %s3325_s3 = scalar_lea.hbm %s4387_s12, 4096  ;;  %s3329_s30 = scalar_lea.hbm %s4603_s19, 8192 }
 0x4b5   : > { %p3326_p13 = scmp.ne.s32.totalorder %s4387_s12, %s3325_s3  ;;  %p3330_p6 = scmp.lt.u32.totalorder %s4387_s12, %s4603_s19 }
 0x4b6   : > { %p3331_p2 = scmp.lt.u32.totalorder %s3329_s30, %s3325_s3  ;;  %p3333_p12 = scmp.lt.u32.totalorder %s3325_s3, %s4387_s12 }
 0x4b7   : > { %p3327_p5 = pnand %p3326_p13, %p4604_p7 }
 0x4b8   : > { %p3332_p8 = por %p3331_p2, %p3330_p6 }
 0x4b9   : > { %p3328_p4 = pneg %p3327_p5 }
 0x4ba   : > { %p3334_p3 = por %p3333_p12, %p3332_p8 }
 0x4bc   : > { %p3335_p9 = pnand %p3334_p3, %p3328_p4 }
 0x4be   : > { %3338 = shalt.err (!%p3335_p9)
}
 0x4bf   : > { %s3523_s20 = smov 128   ;;  %s3524_s24 = smov 8  }
 0x4c0   : > { %2887 = dma.vmem_to_hbm [thread:$0]  (%p4604_p7), %s4382_s28, 4096, %s4387_s12, %s4391_s18, %s3523_s20, %s3523_s20, %s3524_s24  }
 0x4c1 PF: > { %s4605_s27 = sld [smem:[#allocation18_spill]]  ;;  %p2910_p11 = scmp.ge.s32.totalorder %s3509_s15, 2 }
 0x4c2   : > { %s4606_s7 = sld [smem:[#allocation32_spill]] }
 0x4c7   : > { %s2188_s22 = sand.u32 1, %s4605_s27  }
 0x4c8   : > { %p4607_p0 = scmp.ne.s32.totalorder %s4606_s7, 0  ;;  %s2189_s14 = scalar_lea.sflag [#allocation6], %s2188_s22 }
 0x4ca   : > { %p2904_p1 = pnand %p2910_p11, %p4607_p0 }
 0x4cc   : > { %3432 = dma.done.wait (!%p2904_p1), %s2189_s14, 4096  }
 0x4cd   : > { %3434 = vsyncadd (!%p2904_p1), %s2189_s14, 4294963200  ;;  %s26_s15 = sadd.s32 1, %s3509_s15   ;;  %s4609_s21 = sld [smem:[#allocation19_spill]] }
 0x4ce   : > { %p4420_p10 = scmp.ge.s32.totalorder %s26_s15, 10   ;;  %s4610_s27 = sld [smem:[#allocation20_spill]] }
 0x4cf   : > { %s4611_s30 = sld [smem:[#allocation21_spill]]  ;;  %s4612_s1 = sld [smem:[#allocation25_spill]] }
 0x4d0   : > { %s4613_s12 = sld [smem:[#allocation26_spill]]  ;;  %s4614_s18 = sld [smem:[#allocation27_spill]] }
 0x4d1   : > { %s4615_s3 = sld [smem:[#allocation34_spill]]  ;;  %s4616_s17 = smov %s4637_s11 }
 0x4d2   : > { %s4617_s22 = smov %s3445_s23  ;;  %s4618_s14 = sld [smem:[#allocation36_spill]] }
 0x4d3   : > { %s4619_s23 = smov %s3834_s10  ;;  %s4620_s24 = smov %s3453_s25 }
 0x4d4   : > { %s4621_s25 = smov %s3457_s26  ;;  %s4622_s26 = smov %s3889_s13 }
 0x4d5   : > { %s4623_s28 = smov %s3469_s29  ;;  %s4624_s29 = smov %s3819_s9 }
 0x4d6   : > { %s4625_s7 = smov %s3481_s8  ;;  %s4626_s8 = smov %s3825_s6 }
 0x4d7   : > { %s4627_s9 = smov %s4612_s1  ;;  %s4628_s10 = smov %s4613_s12 }
 0x4d8   : > { %s4629_s11 = smov %s4614_s18  ;;  %s4630_s12 = smov %s4615_s3 }
 0x4d9   : > { %s4631_s13 = smov %s4616_s17  ;;  %25 = sbr.rel (!%p4420_p10) target bundleno = 23 (0x17), region = 143 }
 0x4e0   :  { %2194 = vsyncpa [#allocation5], 1 }
 0x4e1   :  { %2196 = vsyncpa [#allocation5 + $0x1], 1 }
 0x4e2   :  { %2197 = vsyncpa [#allocation8], 1 }
 0x4e3   :  { %2199 = vsyncpa [#allocation8 + $0x1], 1 }
 0x4e4   :  { %2200 = vsyncpa [#allocation11], 1 }
 0x4e5   :  { %2201 = vsyncpa [#allocation6], 1 }
 0x4e6   :  { %2203 = vsyncpa [#allocation6 + $0x1], 1 }

</bundles_post_ra>
